<compile_context>
chip_gen: v7x
topology: tpu7x:2x2x1
jax: 0.10.0
libtpu: 0.0.40
codegen_flags: <defaults>
</compile_context>

<pallas_src>
import functools

import jax
import jax.numpy as jnp
from jax.experimental import pallas as pl
from jax.experimental.pallas import tpu as pltpu


def _conv2d_dims(F, Cin, cnn_deep, cnn_nb_ch, pool):
    """Per-layer (freq_bins, in_channels) of the 2D stack + final freq count."""
    dims = []
    f, c = F, Cin
    for _ in range(cnn_deep):
        dims.append((f, c))
        f //= pool
        c = cnn_nb_ch
    return dims, f


def make_fused_kernel(*, T, F, Cin, cnn_deep, cnn_nb_ch, kT, kF, pool,
                      out_conv_len, out_conv_dilation):
    dims2d, _ = _conv2d_dims(F, Cin, cnn_deep, cnn_nb_ch, pool)
    pF = kF // 2
    dil = out_conv_dilation
    pad1d = (out_conv_len - 1) * dil
    n_inputs = 1 + 3 * cnn_deep + 5

    def kernel(*refs):
        x_ref = refs[0]
        o_ref = refs[n_inputs]
        scr = refs[n_inputs + 1:]
        pads2d = scr[:cnn_deep]          # per-layer padded-input scratch
        padA_ref = scr[cnn_deep]         # conv1d-1 padded input
        padB_ref = scr[cnn_deep + 1]     # conv1d-2 padded input
        slab_ref = scr[cnn_deep + 2]     # shared im2col slab

        x = x_ref[0]                                        # (T, F, Cin) f32

        # ---- 2D stack: causal conv2d + per-channel PReLU + freq max-pool ----
        p = 1
        for i, (f, c) in enumerate(dims2d):
            w = refs[p][...]                                # (kT*kF*c, Cout) bf16
            b = refs[p + 1][...]                            # (1, Cout) f32
            a = refs[p + 2][...]                            # (1, Cout) f32
            p += 3
            cout = w.shape[-1]
            fp = f + 2 * pF
            xp = pads2d[i]                                  # VMEM (T+kT-1, fp, c)

            # In-kernel causal time pad (zeros) + reflection freq pad.
            if kT > 1:
                xp[0:kT - 1, :, :] = jnp.zeros((kT - 1, fp, c), jnp.float32)
            xp[kT - 1:kT - 1 + T, pF:pF + f, :] = x
            for j in range(pF):
                xp[kT - 1:kT - 1 + T, j:j + 1, :] = x[:, pF - j:pF - j + 1, :]
                xp[kT - 1:kT - 1 + T, pF + f + j:pF + f + j + 1, :] = \
                    x[:, f - 2 - j:f - 1 - j, :]

            # im2col slab assembled in VMEM, then ONE deep matmul on the MXU.
            rows = T * f
            col = 0
            for dt in range(kT):
                for df in range(kF):
                    slab_ref[0:rows, col:col + c] = \
                        xp[dt:dt + T, df:df + f, :].reshape(rows, c)
                    col += c
            acc = jnp.dot(slab_ref[0:rows, 0:col].astype(jnp.bfloat16), w,
                          preferred_element_type=jnp.float32)
            acc = acc + b
            acc = jnp.where(acc >= 0.0, acc, a * acc)       # per-channel PReLU

            # MaxPool2d((1, pool)): freq only (rows ordered (t, f), f minor).
            fo = f // pool
            acc = acc.reshape(T * fo, pool, cout)
            pooled = acc[:, 0, :]
            for q in range(1, pool):
                pooled = jnp.maximum(pooled, acc[:, q, :])
            x = pooled.reshape(T, fo, cout)

        # ---- relayout to the 1D tail: torch flat index = c * Fo + f ----
        _, fo, cch = x.shape
        if fo == 1:
            x = x.reshape(T, cch)
        else:
            # TODO(synk): path untested (demo has out_cnn_nb_freqs == 1).
            x = jnp.transpose(x, (0, 2, 1)).reshape(T, cch * fo)

        # ---- 1D dilated causal convs (im2col + single matmul each) ----
        w1 = refs[p][...]
        b1 = refs[p + 1][...]
        a1 = refs[p + 2][...]
        w2 = refs[p + 3][...]
        b2 = refs[p + 4][...]

        def caus_conv1d(xv, pad_ref, w, b):
            cin = xv.shape[-1]
            if pad1d > 0:
                pad_ref[0:pad1d, :] = jnp.zeros((pad1d, cin), jnp.float32)
            pad_ref[pad1d:pad1d + T, :] = xv
            col = 0
            for j in range(out_conv_len):
                slab_ref[0:T, col:col + cin] = pad_ref[j * dil:j * dil + T, :]
                col += cin
            return jnp.dot(slab_ref[0:T, 0:col].astype(jnp.bfloat16), w,
                           preferred_element_type=jnp.float32) + b

        h = caus_conv1d(x, padA_ref, w1, b1)
        h = jnp.where(h >= 0.0, h, a1 * h)                  # shared-alpha PReLU
        y = jnp.tanh(caus_conv1d(h, padB_ref, w2, b2))      # (T, Cout_pad)
        o_ref[0] = y

    return kernel


def _full_spec(shape):
    nd = len(shape)
    return pl.BlockSpec(tuple(shape), lambda *_: (0,) * nd)


def cnn2d_forward(x_nchw, params, *, cnn_deep, kT, kF, pool,
                  out_conv_len, out_conv_dilation):
    N, Cin, T, F = x_nchw.shape
    cnn_nb_ch = params["w0"].shape[-1] if cnn_deep > 0 else Cin
    out_nbh = params["w_o1"].shape[-1]
    cout_pad = params["w_o2p"].shape[-1]
    dims2d, fo_last = _conv2d_dims(F, Cin, cnn_deep, cnn_nb_ch, pool)
    pF = kF // 2

    # Static sanity checks mirroring the module's implicit assumptions.
    for (f, _c) in dims2d:
        assert f % pool == 0, "freq bins must divide pool size at every 2D layer"
        assert f >= pF + 1, "reflection pad needs nb_freqs > kF // 2"
    c1d = (cnn_nb_ch if cnn_deep > 0 else Cin) * fo_last
    assert params["w_o1"].shape[0] == out_conv_len * c1d

    # Channels-last so the channel dim contracts on the MXU inside the kernel.
    x = jnp.transpose(x_nchw, (0, 2, 3, 1)).astype(jnp.float32)   # (N, T, F, Cin)

    ins = [x]
    in_specs = [pl.BlockSpec((1, T, F, Cin), lambda n: (n, 0, 0, 0))]

    def add(arr, to_bf16=False):
        arr = arr.astype(jnp.bfloat16) if to_bf16 else arr
        ins.append(arr)
        in_specs.append(_full_spec(arr.shape))

    for i in range(cnn_deep):
        add(params[f"w{i}"], to_bf16=True)
        add(params[f"b{i}"])
        add(params[f"a{i}"])
    add(params["w_o1"], to_bf16=True)
    add(params["b_o1"])
    add(params["a_o"])
    add(params["w_o2p"], to_bf16=True)
    add(params["b_o2p"])

    # VMEM scratch: per-layer padded inputs + one shared im2col slab.
    pad1d = (out_conv_len - 1) * out_conv_dilation
    scratch_shapes = [pltpu.VMEM((T + kT - 1, f + 2 * pF, c), jnp.float32)
                      for (f, c) in dims2d]
    scratch_shapes.append(pltpu.VMEM((T + pad1d, c1d), jnp.float32))
    scratch_shapes.append(pltpu.VMEM((T + pad1d, out_nbh), jnp.float32))
    max_rows = max([T * f for (f, _c) in dims2d] + [T])
    max_cols = max([kT * kF * c for (_f, c) in dims2d]
                   + [out_conv_len * c1d, out_conv_len * out_nbh])
    scratch_shapes.append(pltpu.VMEM((max_rows, max_cols), jnp.float32))

    kernel = make_fused_kernel(T=T, F=F, Cin=Cin, cnn_deep=cnn_deep,
                               cnn_nb_ch=cnn_nb_ch, kT=kT, kF=kF, pool=pool,
                               out_conv_len=out_conv_len,
                               out_conv_dilation=out_conv_dilation)
    y_pad = pl.pallas_call(
        kernel,
        out_shape=jax.ShapeDtypeStruct((N, T, cout_pad), jnp.float32),
        grid=(N,),
        in_specs=in_specs,
        out_specs=pl.BlockSpec((1, T, cout_pad), lambda n: (n, 0, 0)),
        scratch_shapes=scratch_shapes,
        compiler_params=pltpu.CompilerParams(
            dimension_semantics=("parallel",)),
    )(*ins)
    return y_pad[:, :, :3]          # un-pad back to the 3 regression outputs


def init_params(key, nb_in_channels, cnn_deep, cnn_nb_ch, kT, kF,
                out_cnn_nb_freqs, out_conv_len, out_nbh, cout_pad=8):
    """Deterministic init; conv weights stored pre-flattened in im2col layout."""
    params = {}
    keys = jax.random.split(key, 2 * cnn_deep + 4)
    cin = nb_in_channels
    for i in range(cnn_deep):
        fan_in = cin * kT * kF
        params[f"w{i}"] = (fan_in ** -0.5) * jax.random.normal(
            keys[2 * i], (kT * kF * cin, cnn_nb_ch), jnp.float32)
        params[f"b{i}"] = 0.01 * jax.random.normal(
            keys[2 * i + 1], (1, cnn_nb_ch), jnp.float32)
        params[f"a{i}"] = jnp.full((1, cnn_nb_ch), 0.25, jnp.float32)  # PReLU init
        cin = cnn_nb_ch
    c1d = (cnn_nb_ch if cnn_deep > 0 else nb_in_channels) * out_cnn_nb_freqs
    s1 = (c1d * out_conv_len) ** -0.5
    params["w_o1"] = s1 * jax.random.normal(
        keys[-4], (out_conv_len * c1d, out_nbh), jnp.float32)
    params["b_o1"] = 0.01 * jax.random.normal(keys[-3], (1, out_nbh), jnp.float32)
    params["a_o"] = jnp.full((1, 1), 0.25, jnp.float32)     # nn.PReLU() shared alpha
    s2 = (out_nbh * out_conv_len) ** -0.5
    w_o2 = s2 * jax.random.normal(keys[-2], (out_conv_len * out_nbh, 3), jnp.float32)
    b_o2 = 0.01 * jax.random.normal(keys[-1], (1, 3), jnp.float32)
    # Zero-pad the 3 output channels to `cout_pad` (tanh(0)=0 for the pads);
    # the wrapper slices back to 3.  One-time cost at init, not per forward.
    params["w_o2p"] = jnp.pad(w_o2, ((0, 0), (0, cout_pad - 3)))
    params["b_o2p"] = jnp.pad(b_o2, ((0, 0), (0, cout_pad - 3)))
    return params


if __name__ == "__main__":
    # Small, self-consistent configuration of Cnn2D.
    N, C_in, T, F = 2, 4, 8, 16          # batch, mics, time frames, freqs
    cnn_deep, cnn_nb_ch = 2, 8
    kT, kF = 3, 3                        # cnn_krnl_sz
    pool = 4                             # pool_sz = (1, 4)
    out_conv_len, out_conv_dilation, out_nbh = 3, 2, 16
    out_cnn_nb_freqs = F // pool ** cnn_deep   # = 1

    key = jax.random.PRNGKey(0)
    kx, kp = jax.random.split(key)
    x = jax.random.normal(kx, (N, C_in, T, F), jnp.float32)   # NCHW, like PyTorch
    params = init_params(kp, C_in, cnn_deep, cnn_nb_ch, kT, kF,
                         out_cnn_nb_freqs, out_conv_len, out_nbh)

    fwd = jax.jit(functools.partial(
        cnn2d_forward, cnn_deep=cnn_deep, kT=kT, kF=kF, pool=pool,
        out_conv_len=out_conv_len, out_conv_dilation=out_conv_dilation))
    y = jax.block_until_ready(fwd(x, params))
    assert y.shape == (N, T, 3) and bool(jnp.all(jnp.isfinite(y)))
    print("KERNEL_OK")
</pallas_src>

<mosaic_0001>
module attributes {stable_mosaic.version = 11 : i64} {
  func.func @kernel(%arg0: i32, %arg1: memref<1x8x16x4xf32, #tpu.memory_space<vmem>>, %arg2: memref<36x8xbf16, #tpu.memory_space<vmem>>, %arg3: memref<1x8xf32, #tpu.memory_space<vmem>>, %arg4: memref<1x8xf32, #tpu.memory_space<vmem>>, %arg5: memref<72x8xbf16, #tpu.memory_space<vmem>>, %arg6: memref<1x8xf32, #tpu.memory_space<vmem>>, %arg7: memref<1x8xf32, #tpu.memory_space<vmem>>, %arg8: memref<24x16xbf16, #tpu.memory_space<vmem>>, %arg9: memref<1x16xf32, #tpu.memory_space<vmem>>, %arg10: memref<1x1xf32, #tpu.memory_space<vmem>>, %arg11: memref<48x8xbf16, #tpu.memory_space<vmem>>, %arg12: memref<1x8xf32, #tpu.memory_space<vmem>>, %arg13: memref<1x8x8xf32, #tpu.memory_space<vmem>>, %arg14: memref<10x18x4xf32, #tpu.memory_space<vmem>>, %arg15: memref<10x6x8xf32, #tpu.memory_space<vmem>>, %arg16: memref<12x8xf32, #tpu.memory_space<vmem>>, %arg17: memref<12x16xf32, #tpu.memory_space<vmem>>, %arg18: memref<128x72xf32, #tpu.memory_space<vmem>>) attributes {dimension_semantics = [#tpu.dimension_semantics<parallel>], iteration_bounds = array<i64: 2>, scalar_prefetch = 0 : i64, scratch_operands = 5 : i64, tpu.core_type = #tpu.core_type<tc>, window_params = [{transform_indices = @transform_0, window_bounds = array<i64: 1, 8, 16, 4>}, {pipeline_mode = #tpu.pipeline_mode<synchronous>, transform_indices = @transform_1, window_bounds = array<i64: 36, 8>}, {pipeline_mode = #tpu.pipeline_mode<synchronous>, transform_indices = @transform_2, window_bounds = array<i64: 1, 8>}, {pipeline_mode = #tpu.pipeline_mode<synchronous>, transform_indices = @transform_3, window_bounds = array<i64: 1, 8>}, {pipeline_mode = #tpu.pipeline_mode<synchronous>, transform_indices = @transform_4, window_bounds = array<i64: 72, 8>}, {pipeline_mode = #tpu.pipeline_mode<synchronous>, transform_indices = @transform_5, window_bounds = array<i64: 1, 8>}, {pipeline_mode = #tpu.pipeline_mode<synchronous>, transform_indices = @transform_6, window_bounds = array<i64: 1, 8>}, {pipeline_mode = #tpu.pipeline_mode<synchronous>, transform_indices = @transform_7, window_bounds = array<i64: 24, 16>}, {pipeline_mode = #tpu.pipeline_mode<synchronous>, transform_indices = @transform_8, window_bounds = array<i64: 1, 16>}, {pipeline_mode = #tpu.pipeline_mode<synchronous>, transform_indices = @transform_9, window_bounds = array<i64: 1, 1>}, {pipeline_mode = #tpu.pipeline_mode<synchronous>, transform_indices = @transform_10, window_bounds = array<i64: 48, 8>}, {pipeline_mode = #tpu.pipeline_mode<synchronous>, transform_indices = @transform_11, window_bounds = array<i64: 1, 8>}, {transform_indices = @transform_12, window_bounds = array<i64: 1, 8, 8>}]} {
    %c0 = arith.constant 0 : index
    %c0_0 = arith.constant 0 : index
    %c0_1 = arith.constant 0 : index
    %c0_2 = arith.constant 0 : index
    %0 = vector.load %arg1[%c0, %c0_0, %c0_1, %c0_2] : memref<1x8x16x4xf32, #tpu.memory_space<vmem>>, vector<1x8x16x4xf32>
    %1 = vector.shape_cast %0 : vector<1x8x16x4xf32> to vector<8x16x4xf32>
    %c0_3 = arith.constant 0 : index
    %c0_4 = arith.constant 0 : index
    %2 = vector.load %arg2[%c0_3, %c0_4] : memref<36x8xbf16, #tpu.memory_space<vmem>>, vector<36x8xbf16>
    %c0_5 = arith.constant 0 : index
    %c0_6 = arith.constant 0 : index
    %3 = vector.load %arg3[%c0_5, %c0_6] : memref<1x8xf32, #tpu.memory_space<vmem>>, vector<1x8xf32>
    %c0_7 = arith.constant 0 : index
    %c0_8 = arith.constant 0 : index
    %4 = vector.load %arg4[%c0_7, %c0_8] : memref<1x8xf32, #tpu.memory_space<vmem>>, vector<1x8xf32>
    %cst = arith.constant 0.000000e+00 : f32
    %5 = vector.broadcast %cst : f32 to vector<2x18x4xf32>
    %c0_9 = arith.constant 0 : index
    %c0_10 = arith.constant 0 : index
    %c0_11 = arith.constant 0 : index
    %6 = vector.load %arg14[%c0_9, %c0_10, %c0_11] : memref<10x18x4xf32, #tpu.memory_space<vmem>>, vector<2x18x4xf32>
    tpu.vector_store %arg14[%c0_9, %c0_10, %c0_11], %5 {strides = array<i32>} : memref<10x18x4xf32, #tpu.memory_space<vmem>>, vector<2x18x4xf32>,
    %c2 = arith.constant 2 : index
    %c1 = arith.constant 1 : index
    %c0_12 = arith.constant 0 : index
    %7 = vector.load %arg14[%c2, %c1, %c0_12] : memref<10x18x4xf32, #tpu.memory_space<vmem>>, vector<8x16x4xf32>
    tpu.vector_store %arg14[%c2, %c1, %c0_12], %1 {strides = array<i32>} : memref<10x18x4xf32, #tpu.memory_space<vmem>>, vector<8x16x4xf32>,
    %8 = vector.extract_strided_slice %1 {offsets = [0, 1, 0], sizes = [8, 1, 4], strides = [1, 1, 1]} : vector<8x16x4xf32> to vector<8x1x4xf32>
    %c2_13 = arith.constant 2 : index
    %c0_14 = arith.constant 0 : index
    %c0_15 = arith.constant 0 : index
    %9 = vector.load %arg14[%c2_13, %c0_14, %c0_15] : memref<10x18x4xf32, #tpu.memory_space<vmem>>, vector<8x1x4xf32>
    tpu.vector_store %arg14[%c2_13, %c0_14, %c0_15], %8 {strides = array<i32>} : memref<10x18x4xf32, #tpu.memory_space<vmem>>, vector<8x1x4xf32>,
    %10 = vector.extract_strided_slice %1 {offsets = [0, 14, 0], sizes = [8, 1, 4], strides = [1, 1, 1]} : vector<8x16x4xf32> to vector<8x1x4xf32>
    %c2_16 = arith.constant 2 : index
    %c17 = arith.constant 17 : index
    %c0_17 = arith.constant 0 : index
    %11 = vector.load %arg14[%c2_16, %c17, %c0_17] : memref<10x18x4xf32, #tpu.memory_space<vmem>>, vector<8x1x4xf32>
    tpu.vector_store %arg14[%c2_16, %c17, %c0_17], %10 {strides = array<i32>} : memref<10x18x4xf32, #tpu.memory_space<vmem>>, vector<8x1x4xf32>,
    %c0_18 = arith.constant 0 : index
    %c0_19 = arith.constant 0 : index
    %c0_20 = arith.constant 0 : index
    %12 = vector.load %arg14[%c0_18, %c0_19, %c0_20] : memref<10x18x4xf32, #tpu.memory_space<vmem>>, vector<8x16x4xf32>
    %13 = vector.shape_cast %12 : vector<8x16x4xf32> to vector<128x4xf32>
    %c0_21 = arith.constant 0 : index
    %c0_22 = arith.constant 0 : index
    %14 = vector.load %arg18[%c0_21, %c0_22] : memref<128x72xf32, #tpu.memory_space<vmem>>, vector<128x4xf32>
    tpu.vector_store %arg18[%c0_21, %c0_22], %13 {strides = array<i32>} : memref<128x72xf32, #tpu.memory_space<vmem>>, vector<128x4xf32>,
    %c0_23 = arith.constant 0 : index
    %c1_24 = arith.constant 1 : index
    %c0_25 = arith.constant 0 : index
    %15 = vector.load %arg14[%c0_23, %c1_24, %c0_25] : memref<10x18x4xf32, #tpu.memory_space<vmem>>, vector<8x16x4xf32>
    %16 = vector.shape_cast %15 : vector<8x16x4xf32> to vector<128x4xf32>
    %c0_26 = arith.constant 0 : index
    %c4 = arith.constant 4 : index
    %17 = vector.load %arg18[%c0_26, %c4] : memref<128x72xf32, #tpu.memory_space<vmem>>, vector<128x4xf32>
    tpu.vector_store %arg18[%c0_26, %c4], %16 {strides = array<i32>} : memref<128x72xf32, #tpu.memory_space<vmem>>, vector<128x4xf32>,
    %c0_27 = arith.constant 0 : index
    %c2_28 = arith.constant 2 : index
    %c0_29 = arith.constant 0 : index
    %18 = vector.load %arg14[%c0_27, %c2_28, %c0_29] : memref<10x18x4xf32, #tpu.memory_space<vmem>>, vector<8x16x4xf32>
    %19 = vector.shape_cast %18 : vector<8x16x4xf32> to vector<128x4xf32>
    %c0_30 = arith.constant 0 : index
    %c8 = arith.constant 8 : index
    %20 = vector.load %arg18[%c0_30, %c8] : memref<128x72xf32, #tpu.memory_space<vmem>>, vector<128x4xf32>
    tpu.vector_store %arg18[%c0_30, %c8], %19 {strides = array<i32>} : memref<128x72xf32, #tpu.memory_space<vmem>>, vector<128x4xf32>,
    %c1_31 = arith.constant 1 : index
    %c0_32 = arith.constant 0 : index
    %c0_33 = arith.constant 0 : index
    %21 = vector.load %arg14[%c1_31, %c0_32, %c0_33] : memref<10x18x4xf32, #tpu.memory_space<vmem>>, vector<8x16x4xf32>
    %22 = vector.shape_cast %21 : vector<8x16x4xf32> to vector<128x4xf32>
    %c0_34 = arith.constant 0 : index
    %c12 = arith.constant 12 : index
    %23 = vector.load %arg18[%c0_34, %c12] : memref<128x72xf32, #tpu.memory_space<vmem>>, vector<128x4xf32>
    tpu.vector_store %arg18[%c0_34, %c12], %22 {strides = array<i32>} : memref<128x72xf32, #tpu.memory_space<vmem>>, vector<128x4xf32>,
    %c1_35 = arith.constant 1 : index
    %c1_36 = arith.constant 1 : index
    %c0_37 = arith.constant 0 : index
    %24 = vector.load %arg14[%c1_35, %c1_36, %c0_37] : memref<10x18x4xf32, #tpu.memory_space<vmem>>, vector<8x16x4xf32>
    %25 = vector.shape_cast %24 : vector<8x16x4xf32> to vector<128x4xf32>
    %c0_38 = arith.constant 0 : index
    %c16 = arith.constant 16 : index
    %26 = vector.load %arg18[%c0_38, %c16] : memref<128x72xf32, #tpu.memory_space<vmem>>, vector<128x4xf32>
    tpu.vector_store %arg18[%c0_38, %c16], %25 {strides = array<i32>} : memref<128x72xf32, #tpu.memory_space<vmem>>, vector<128x4xf32>,
    %c1_39 = arith.constant 1 : index
    %c2_40 = arith.constant 2 : index
    %c0_41 = arith.constant 0 : index
    %27 = vector.load %arg14[%c1_39, %c2_40, %c0_41] : memref<10x18x4xf32, #tpu.memory_space<vmem>>, vector<8x16x4xf32>
    %28 = vector.shape_cast %27 : vector<8x16x4xf32> to vector<128x4xf32>
    %c0_42 = arith.constant 0 : index
    %c20 = arith.constant 20 : index
    %29 = vector.load %arg18[%c0_42, %c20] : memref<128x72xf32, #tpu.memory_space<vmem>>, vector<128x4xf32>
    tpu.vector_store %arg18[%c0_42, %c20], %28 {strides = array<i32>} : memref<128x72xf32, #tpu.memory_space<vmem>>, vector<128x4xf32>,
    %c2_43 = arith.constant 2 : index
    %c0_44 = arith.constant 0 : index
    %c0_45 = arith.constant 0 : index
    %30 = vector.load %arg14[%c2_43, %c0_44, %c0_45] : memref<10x18x4xf32, #tpu.memory_space<vmem>>, vector<8x16x4xf32>
    %31 = vector.shape_cast %30 : vector<8x16x4xf32> to vector<128x4xf32>
    %c0_46 = arith.constant 0 : index
    %c24 = arith.constant 24 : index
    %32 = vector.load %arg18[%c0_46, %c24] : memref<128x72xf32, #tpu.memory_space<vmem>>, vector<128x4xf32>
    tpu.vector_store %arg18[%c0_46, %c24], %31 {strides = array<i32>} : memref<128x72xf32, #tpu.memory_space<vmem>>, vector<128x4xf32>,
    %c2_47 = arith.constant 2 : index
    %c1_48 = arith.constant 1 : index
    %c0_49 = arith.constant 0 : index
    %33 = vector.load %arg14[%c2_47, %c1_48, %c0_49] : memref<10x18x4xf32, #tpu.memory_space<vmem>>, vector<8x16x4xf32>
    %34 = vector.shape_cast %33 : vector<8x16x4xf32> to vector<128x4xf32>
    %c0_50 = arith.constant 0 : index
    %c28 = arith.constant 28 : index
    %35 = vector.load %arg18[%c0_50, %c28] : memref<128x72xf32, #tpu.memory_space<vmem>>, vector<128x4xf32>
    tpu.vector_store %arg18[%c0_50, %c28], %34 {strides = array<i32>} : memref<128x72xf32, #tpu.memory_space<vmem>>, vector<128x4xf32>,
    %c2_51 = arith.constant 2 : index
    %c2_52 = arith.constant 2 : index
    %c0_53 = arith.constant 0 : index
    %36 = vector.load %arg14[%c2_51, %c2_52, %c0_53] : memref<10x18x4xf32, #tpu.memory_space<vmem>>, vector<8x16x4xf32>
    %37 = vector.shape_cast %36 : vector<8x16x4xf32> to vector<128x4xf32>
    %c0_54 = arith.constant 0 : index
    %c32 = arith.constant 32 : index
    %38 = vector.load %arg18[%c0_54, %c32] : memref<128x72xf32, #tpu.memory_space<vmem>>, vector<128x4xf32>
    tpu.vector_store %arg18[%c0_54, %c32], %37 {strides = array<i32>} : memref<128x72xf32, #tpu.memory_space<vmem>>, vector<128x4xf32>,
    %c0_55 = arith.constant 0 : index
    %c0_56 = arith.constant 0 : index
    %39 = vector.load %arg18[%c0_55, %c0_56] : memref<128x72xf32, #tpu.memory_space<vmem>>, vector<128x36xf32>
    %40 = arith.truncf %39 : vector<128x36xf32> to vector<128x36xbf16>
    %cst_57 = arith.constant dense<0.000000e+00> : vector<128x8xf32>
    %41 = tpu.matmul %40, %2, %cst_57 {dimension_numbers = #tpu.dot_dimension_numbers<[1], [0], [0], [1], [0, 0, 1, 1], [], []>} : vector<128x36xbf16>, vector<36x8xbf16>, vector<128x8xf32> -> vector<128x8xf32>
    %42 = vector.broadcast %3 : vector<1x8xf32> to vector<128x8xf32>
    %43 = arith.addf %41, %42 : vector<128x8xf32>
    %cst_58 = arith.constant 0.000000e+00 : f32
    %44 = vector.broadcast %cst_58 : f32 to vector<128x8xf32>
    %45 = arith.cmpf oge, %43, %44 : vector<128x8xf32>
    %46 = vector.broadcast %4 : vector<1x8xf32> to vector<128x8xf32>
    %47 = arith.mulf %46, %43 : vector<128x8xf32>
    %48 = arith.select %45, %43, %47 : vector<128x8xi1>, vector<128x8xf32>
    %49 = vector.shape_cast %48 : vector<128x8xf32> to vector<32x4x8xf32>
    %50 = vector.extract_strided_slice %49 {offsets = [0, 0, 0], sizes = [32, 1, 8], strides = [1, 1, 1]} : vector<32x4x8xf32> to vector<32x1x8xf32>
    %51 = vector.shape_cast %50 : vector<32x1x8xf32> to vector<32x8xf32>
    %52 = vector.extract_strided_slice %49 {offsets = [0, 1, 0], sizes = [32, 1, 8], strides = [1, 1, 1]} : vector<32x4x8xf32> to vector<32x1x8xf32>
    %53 = vector.shape_cast %52 : vector<32x1x8xf32> to vector<32x8xf32>
    %54 = arith.maximumf %51, %53 : vector<32x8xf32>
    %55 = vector.extract_strided_slice %49 {offsets = [0, 2, 0], sizes = [32, 1, 8], strides = [1, 1, 1]} : vector<32x4x8xf32> to vector<32x1x8xf32>
    %56 = vector.shape_cast %55 : vector<32x1x8xf32> to vector<32x8xf32>
    %57 = arith.maximumf %54, %56 : vector<32x8xf32>
    %58 = vector.extract_strided_slice %49 {offsets = [0, 3, 0], sizes = [32, 1, 8], strides = [1, 1, 1]} : vector<32x4x8xf32> to vector<32x1x8xf32>
    %59 = vector.shape_cast %58 : vector<32x1x8xf32> to vector<32x8xf32>
    %60 = arith.maximumf %57, %59 : vector<32x8xf32>
    %61 = vector.shape_cast %60 : vector<32x8xf32> to vector<8x4x8xf32>
    %c0_59 = arith.constant 0 : index
    %c0_60 = arith.constant 0 : index
    %62 = vector.load %arg5[%c0_59, %c0_60] : memref<72x8xbf16, #tpu.memory_space<vmem>>, vector<72x8xbf16>
    %c0_61 = arith.constant 0 : index
    %c0_62 = arith.constant 0 : index
    %63 = vector.load %arg6[%c0_61, %c0_62] : memref<1x8xf32, #tpu.memory_space<vmem>>, vector<1x8xf32>
    %c0_63 = arith.constant 0 : index
    %c0_64 = arith.constant 0 : index
    %64 = vector.load %arg7[%c0_63, %c0_64] : memref<1x8xf32, #tpu.memory_space<vmem>>, vector<1x8xf32>
    %cst_65 = arith.constant 0.000000e+00 : f32
    %65 = vector.broadcast %cst_65 : f32 to vector<2x6x8xf32>
    %c0_66 = arith.constant 0 : index
    %c0_67 = arith.constant 0 : index
    %c0_68 = arith.constant 0 : index
    %66 = vector.load %arg15[%c0_66, %c0_67, %c0_68] : memref<10x6x8xf32, #tpu.memory_space<vmem>>, vector<2x6x8xf32>
    tpu.vector_store %arg15[%c0_66, %c0_67, %c0_68], %65 {strides = array<i32>} : memref<10x6x8xf32, #tpu.memory_space<vmem>>, vector<2x6x8xf32>,
    %c2_69 = arith.constant 2 : index
    %c1_70 = arith.constant 1 : index
    %c0_71 = arith.constant 0 : index
    %67 = vector.load %arg15[%c2_69, %c1_70, %c0_71] : memref<10x6x8xf32, #tpu.memory_space<vmem>>, vector<8x4x8xf32>
    tpu.vector_store %arg15[%c2_69, %c1_70, %c0_71], %61 {strides = array<i32>} : memref<10x6x8xf32, #tpu.memory_space<vmem>>, vector<8x4x8xf32>,
    %68 = vector.extract_strided_slice %61 {offsets = [0, 1, 0], sizes = [8, 1, 8], strides = [1, 1, 1]} : vector<8x4x8xf32> to vector<8x1x8xf32>
    %c2_72 = arith.constant 2 : index
    %c0_73 = arith.constant 0 : index
    %c0_74 = arith.constant 0 : index
    %69 = vector.load %arg15[%c2_72, %c0_73, %c0_74] : memref<10x6x8xf32, #tpu.memory_space<vmem>>, vector<8x1x8xf32>
    tpu.vector_store %arg15[%c2_72, %c0_73, %c0_74], %68 {strides = array<i32>} : memref<10x6x8xf32, #tpu.memory_space<vmem>>, vector<8x1x8xf32>,
    %70 = vector.extract_strided_slice %61 {offsets = [0, 2, 0], sizes = [8, 1, 8], strides = [1, 1, 1]} : vector<8x4x8xf32> to vector<8x1x8xf32>
    %c2_75 = arith.constant 2 : index
    %c5 = arith.constant 5 : index
    %c0_76 = arith.constant 0 : index
    %71 = vector.load %arg15[%c2_75, %c5, %c0_76] : memref<10x6x8xf32, #tpu.memory_space<vmem>>, vector<8x1x8xf32>
    tpu.vector_store %arg15[%c2_75, %c5, %c0_76], %70 {strides = array<i32>} : memref<10x6x8xf32, #tpu.memory_space<vmem>>, vector<8x1x8xf32>,
    %c0_77 = arith.constant 0 : index
    %c0_78 = arith.constant 0 : index
    %c0_79 = arith.constant 0 : index
    %72 = vector.load %arg15[%c0_77, %c0_78, %c0_79] : memref<10x6x8xf32, #tpu.memory_space<vmem>>, vector<8x4x8xf32>
    %73 = vector.shape_cast %72 : vector<8x4x8xf32> to vector<32x8xf32>
    %c0_80 = arith.constant 0 : index
    %c0_81 = arith.constant 0 : index
    %74 = vector.load %arg18[%c0_80, %c0_81] : memref<128x72xf32, #tpu.memory_space<vmem>>, vector<32x8xf32>
    tpu.vector_store %arg18[%c0_80, %c0_81], %73 {strides = array<i32>} : memref<128x72xf32, #tpu.memory_space<vmem>>, vector<32x8xf32>,
    %c0_82 = arith.constant 0 : index
    %c1_83 = arith.constant 1 : index
    %c0_84 = arith.constant 0 : index
    %75 = vector.load %arg15[%c0_82, %c1_83, %c0_84] : memref<10x6x8xf32, #tpu.memory_space<vmem>>, vector<8x4x8xf32>
    %76 = vector.shape_cast %75 : vector<8x4x8xf32> to vector<32x8xf32>
    %c0_85 = arith.constant 0 : index
    %c8_86 = arith.constant 8 : index
    %77 = vector.load %arg18[%c0_85, %c8_86] : memref<128x72xf32, #tpu.memory_space<vmem>>, vector<32x8xf32>
    tpu.vector_store %arg18[%c0_85, %c8_86], %76 {strides = array<i32>} : memref<128x72xf32, #tpu.memory_space<vmem>>, vector<32x8xf32>,
    %c0_87 = arith.constant 0 : index
    %c2_88 = arith.constant 2 : index
    %c0_89 = arith.constant 0 : index
    %78 = vector.load %arg15[%c0_87, %c2_88, %c0_89] : memref<10x6x8xf32, #tpu.memory_space<vmem>>, vector<8x4x8xf32>
    %79 = vector.shape_cast %78 : vector<8x4x8xf32> to vector<32x8xf32>
    %c0_90 = arith.constant 0 : index
    %c16_91 = arith.constant 16 : index
    %80 = vector.load %arg18[%c0_90, %c16_91] : memref<128x72xf32, #tpu.memory_space<vmem>>, vector<32x8xf32>
    tpu.vector_store %arg18[%c0_90, %c16_91], %79 {strides = array<i32>} : memref<128x72xf32, #tpu.memory_space<vmem>>, vector<32x8xf32>,
    %c1_92 = arith.constant 1 : index
    %c0_93 = arith.constant 0 : index
    %c0_94 = arith.constant 0 : index
    %81 = vector.load %arg15[%c1_92, %c0_93, %c0_94] : memref<10x6x8xf32, #tpu.memory_space<vmem>>, vector<8x4x8xf32>
    %82 = vector.shape_cast %81 : vector<8x4x8xf32> to vector<32x8xf32>
    %c0_95 = arith.constant 0 : index
    %c24_96 = arith.constant 24 : index
    %83 = vector.load %arg18[%c0_95, %c24_96] : memref<128x72xf32, #tpu.memory_space<vmem>>, vector<32x8xf32>
    tpu.vector_store %arg18[%c0_95, %c24_96], %82 {strides = array<i32>} : memref<128x72xf32, #tpu.memory_space<vmem>>, vector<32x8xf32>,
    %c1_97 = arith.constant 1 : index
    %c1_98 = arith.constant 1 : index
    %c0_99 = arith.constant 0 : index
    %84 = vector.load %arg15[%c1_97, %c1_98, %c0_99] : memref<10x6x8xf32, #tpu.memory_space<vmem>>, vector<8x4x8xf32>
    %85 = vector.shape_cast %84 : vector<8x4x8xf32> to vector<32x8xf32>
    %c0_100 = arith.constant 0 : index
    %c32_101 = arith.constant 32 : index
    %86 = vector.load %arg18[%c0_100, %c32_101] : memref<128x72xf32, #tpu.memory_space<vmem>>, vector<32x8xf32>
    tpu.vector_store %arg18[%c0_100, %c32_101], %85 {strides = array<i32>} : memref<128x72xf32, #tpu.memory_space<vmem>>, vector<32x8xf32>,
    %c1_102 = arith.constant 1 : index
    %c2_103 = arith.constant 2 : index
    %c0_104 = arith.constant 0 : index
    %87 = vector.load %arg15[%c1_102, %c2_103, %c0_104] : memref<10x6x8xf32, #tpu.memory_space<vmem>>, vector<8x4x8xf32>
    %88 = vector.shape_cast %87 : vector<8x4x8xf32> to vector<32x8xf32>
    %c0_105 = arith.constant 0 : index
    %c40 = arith.constant 40 : index
    %89 = vector.load %arg18[%c0_105, %c40] : memref<128x72xf32, #tpu.memory_space<vmem>>, vector<32x8xf32>
    tpu.vector_store %arg18[%c0_105, %c40], %88 {strides = array<i32>} : memref<128x72xf32, #tpu.memory_space<vmem>>, vector<32x8xf32>,
    %c2_106 = arith.constant 2 : index
    %c0_107 = arith.constant 0 : index
    %c0_108 = arith.constant 0 : index
    %90 = vector.load %arg15[%c2_106, %c0_107, %c0_108] : memref<10x6x8xf32, #tpu.memory_space<vmem>>, vector<8x4x8xf32>
    %91 = vector.shape_cast %90 : vector<8x4x8xf32> to vector<32x8xf32>
    %c0_109 = arith.constant 0 : index
    %c48 = arith.constant 48 : index
    %92 = vector.load %arg18[%c0_109, %c48] : memref<128x72xf32, #tpu.memory_space<vmem>>, vector<32x8xf32>
    tpu.vector_store %arg18[%c0_109, %c48], %91 {strides = array<i32>} : memref<128x72xf32, #tpu.memory_space<vmem>>, vector<32x8xf32>,
    %c2_110 = arith.constant 2 : index
    %c1_111 = arith.constant 1 : index
    %c0_112 = arith.constant 0 : index
    %93 = vector.load %arg15[%c2_110, %c1_111, %c0_112] : memref<10x6x8xf32, #tpu.memory_space<vmem>>, vector<8x4x8xf32>
    %94 = vector.shape_cast %93 : vector<8x4x8xf32> to vector<32x8xf32>
    %c0_113 = arith.constant 0 : index
    %c56 = arith.constant 56 : index
    %95 = vector.load %arg18[%c0_113, %c56] : memref<128x72xf32, #tpu.memory_space<vmem>>, vector<32x8xf32>
    tpu.vector_store %arg18[%c0_113, %c56], %94 {strides = array<i32>} : memref<128x72xf32, #tpu.memory_space<vmem>>, vector<32x8xf32>,
    %c2_114 = arith.constant 2 : index
    %c2_115 = arith.constant 2 : index
    %c0_116 = arith.constant 0 : index
    %96 = vector.load %arg15[%c2_114, %c2_115, %c0_116] : memref<10x6x8xf32, #tpu.memory_space<vmem>>, vector<8x4x8xf32>
    %97 = vector.shape_cast %96 : vector<8x4x8xf32> to vector<32x8xf32>
    %c0_117 = arith.constant 0 : index
    %c64 = arith.constant 64 : index
    %98 = vector.load %arg18[%c0_117, %c64] : memref<128x72xf32, #tpu.memory_space<vmem>>, vector<32x8xf32>
    tpu.vector_store %arg18[%c0_117, %c64], %97 {strides = array<i32>} : memref<128x72xf32, #tpu.memory_space<vmem>>, vector<32x8xf32>,
    %c0_118 = arith.constant 0 : index
    %c0_119 = arith.constant 0 : index
    %99 = vector.load %arg18[%c0_118, %c0_119] : memref<128x72xf32, #tpu.memory_space<vmem>>, vector<32x72xf32>
    %100 = arith.truncf %99 : vector<32x72xf32> to vector<32x72xbf16>
    %cst_120 = arith.constant dense<0.000000e+00> : vector<32x8xf32>
    %101 = tpu.matmul %100, %62, %cst_120 {dimension_numbers = #tpu.dot_dimension_numbers<[1], [0], [0], [1], [0, 0, 1, 1], [], []>} : vector<32x72xbf16>, vector<72x8xbf16>, vector<32x8xf32> -> vector<32x8xf32>
    %102 = vector.broadcast %63 : vector<1x8xf32> to vector<32x8xf32>
    %103 = arith.addf %101, %102 : vector<32x8xf32>
    %cst_121 = arith.constant 0.000000e+00 : f32
    %104 = vector.broadcast %cst_121 : f32 to vector<32x8xf32>
    %105 = arith.cmpf oge, %103, %104 : vector<32x8xf32>
    %106 = vector.broadcast %64 : vector<1x8xf32> to vector<32x8xf32>
    %107 = arith.mulf %106, %103 : vector<32x8xf32>
    %108 = arith.select %105, %103, %107 : vector<32x8xi1>, vector<32x8xf32>
    %109 = vector.shape_cast %108 : vector<32x8xf32> to vector<8x4x8xf32>
    %110 = vector.extract_strided_slice %109 {offsets = [0, 0, 0], sizes = [8, 1, 8], strides = [1, 1, 1]} : vector<8x4x8xf32> to vector<8x1x8xf32>
    %111 = vector.shape_cast %110 : vector<8x1x8xf32> to vector<8x8xf32>
    %112 = vector.extract_strided_slice %109 {offsets = [0, 1, 0], sizes = [8, 1, 8], strides = [1, 1, 1]} : vector<8x4x8xf32> to vector<8x1x8xf32>
    %113 = vector.shape_cast %112 : vector<8x1x8xf32> to vector<8x8xf32>
    %114 = arith.maximumf %111, %113 : vector<8x8xf32>
    %115 = vector.extract_strided_slice %109 {offsets = [0, 2, 0], sizes = [8, 1, 8], strides = [1, 1, 1]} : vector<8x4x8xf32> to vector<8x1x8xf32>
    %116 = vector.shape_cast %115 : vector<8x1x8xf32> to vector<8x8xf32>
    %117 = arith.maximumf %114, %116 : vector<8x8xf32>
    %118 = vector.extract_strided_slice %109 {offsets = [0, 3, 0], sizes = [8, 1, 8], strides = [1, 1, 1]} : vector<8x4x8xf32> to vector<8x1x8xf32>
    %119 = vector.shape_cast %118 : vector<8x1x8xf32> to vector<8x8xf32>
    %120 = arith.maximumf %117, %119 : vector<8x8xf32>
    %121 = vector.shape_cast %120 : vector<8x8xf32> to vector<8x1x8xf32>
    %122 = vector.shape_cast %121 : vector<8x1x8xf32> to vector<8x8xf32>
    %c0_122 = arith.constant 0 : index
    %c0_123 = arith.constant 0 : index
    %123 = vector.load %arg8[%c0_122, %c0_123] : memref<24x16xbf16, #tpu.memory_space<vmem>>, vector<24x16xbf16>
    %c0_124 = arith.constant 0 : index
    %c0_125 = arith.constant 0 : index
    %124 = vector.load %arg9[%c0_124, %c0_125] : memref<1x16xf32, #tpu.memory_space<vmem>>, vector<1x16xf32>
    %c0_126 = arith.constant 0 : index
    %c0_127 = arith.constant 0 : index
    %125 = vector.load %arg10[%c0_126, %c0_127] : memref<1x1xf32, #tpu.memory_space<vmem>>, vector<1x1xf32>
    %c0_128 = arith.constant 0 : index
    %c0_129 = arith.constant 0 : index
    %126 = vector.load %arg11[%c0_128, %c0_129] : memref<48x8xbf16, #tpu.memory_space<vmem>>, vector<48x8xbf16>
    %c0_130 = arith.constant 0 : index
    %c0_131 = arith.constant 0 : index
    %127 = vector.load %arg12[%c0_130, %c0_131] : memref<1x8xf32, #tpu.memory_space<vmem>>, vector<1x8xf32>
    %cst_132 = arith.constant 0.000000e+00 : f32
    %128 = vector.broadcast %cst_132 : f32 to vector<4x8xf32>
    %c0_133 = arith.constant 0 : index
    %c0_134 = arith.constant 0 : index
    %129 = vector.load %arg16[%c0_133, %c0_134] : memref<12x8xf32, #tpu.memory_space<vmem>>, vector<4x8xf32>
    tpu.vector_store %arg16[%c0_133, %c0_134], %128 {strides = array<i32>} : memref<12x8xf32, #tpu.memory_space<vmem>>, vector<4x8xf32>,
    %c4_135 = arith.constant 4 : index
    %c0_136 = arith.constant 0 : index
    %130 = vector.load %arg16[%c4_135, %c0_136] : memref<12x8xf32, #tpu.memory_space<vmem>>, vector<8x8xf32>
    tpu.vector_store %arg16[%c4_135, %c0_136], %122 {strides = array<i32>} : memref<12x8xf32, #tpu.memory_space<vmem>>, vector<8x8xf32>,
    %c0_137 = arith.constant 0 : index
    %c0_138 = arith.constant 0 : index
    %131 = vector.load %arg16[%c0_137, %c0_138] : memref<12x8xf32, #tpu.memory_space<vmem>>, vector<8x8xf32>
    %c0_139 = arith.constant 0 : index
    %c0_140 = arith.constant 0 : index
    %132 = vector.load %arg18[%c0_139, %c0_140] : memref<128x72xf32, #tpu.memory_space<vmem>>, vector<8x8xf32>
    tpu.vector_store %arg18[%c0_139, %c0_140], %131 {strides = array<i32>} : memref<128x72xf32, #tpu.memory_space<vmem>>, vector<8x8xf32>,
    %c2_141 = arith.constant 2 : index
    %c0_142 = arith.constant 0 : index
    %133 = vector.load %arg16[%c2_141, %c0_142] : memref<12x8xf32, #tpu.memory_space<vmem>>, vector<8x8xf32>
    %c0_143 = arith.constant 0 : index
    %c8_144 = arith.constant 8 : index
    %134 = vector.load %arg18[%c0_143, %c8_144] : memref<128x72xf32, #tpu.memory_space<vmem>>, vector<8x8xf32>
    tpu.vector_store %arg18[%c0_143, %c8_144], %133 {strides = array<i32>} : memref<128x72xf32, #tpu.memory_space<vmem>>, vector<8x8xf32>,
    %c4_145 = arith.constant 4 : index
    %c0_146 = arith.constant 0 : index
    %135 = vector.load %arg16[%c4_145, %c0_146] : memref<12x8xf32, #tpu.memory_space<vmem>>, vector<8x8xf32>
    %c0_147 = arith.constant 0 : index
    %c16_148 = arith.constant 16 : index
    %136 = vector.load %arg18[%c0_147, %c16_148] : memref<128x72xf32, #tpu.memory_space<vmem>>, vector<8x8xf32>
    tpu.vector_store %arg18[%c0_147, %c16_148], %135 {strides = array<i32>} : memref<128x72xf32, #tpu.memory_space<vmem>>, vector<8x8xf32>,
    %c0_149 = arith.constant 0 : index
    %c0_150 = arith.constant 0 : index
    %137 = vector.load %arg18[%c0_149, %c0_150] : memref<128x72xf32, #tpu.memory_space<vmem>>, vector<8x24xf32>
    %138 = arith.truncf %137 : vector<8x24xf32> to vector<8x24xbf16>
    %cst_151 = arith.constant dense<0.000000e+00> : vector<8x16xf32>
    %139 = tpu.matmul %138, %123, %cst_151 {dimension_numbers = #tpu.dot_dimension_numbers<[1], [0], [0], [1], [0, 0, 1, 1], [], []>} : vector<8x24xbf16>, vector<24x16xbf16>, vector<8x16xf32> -> vector<8x16xf32>
    %140 = vector.broadcast %124 : vector<1x16xf32> to vector<8x16xf32>
    %141 = arith.addf %139, %140 : vector<8x16xf32>
    %cst_152 = arith.constant 0.000000e+00 : f32
    %142 = vector.broadcast %cst_152 : f32 to vector<8x16xf32>
    %143 = arith.cmpf oge, %141, %142 : vector<8x16xf32>
    %144 = vector.broadcast %125 : vector<1x1xf32> to vector<8x16xf32>
    %145 = arith.mulf %144, %141 : vector<8x16xf32>
    %146 = arith.select %143, %141, %145 : vector<8x16xi1>, vector<8x16xf32>
    %cst_153 = arith.constant 0.000000e+00 : f32
    %147 = vector.broadcast %cst_153 : f32 to vector<4x16xf32>
    %c0_154 = arith.constant 0 : index
    %c0_155 = arith.constant 0 : index
    %148 = vector.load %arg17[%c0_154, %c0_155] : memref<12x16xf32, #tpu.memory_space<vmem>>, vector<4x16xf32>
    tpu.vector_store %arg17[%c0_154, %c0_155], %147 {strides = array<i32>} : memref<12x16xf32, #tpu.memory_space<vmem>>, vector<4x16xf32>,
    %c4_156 = arith.constant 4 : index
    %c0_157 = arith.constant 0 : index
    %149 = vector.load %arg17[%c4_156, %c0_157] : memref<12x16xf32, #tpu.memory_space<vmem>>, vector<8x16xf32>
    tpu.vector_store %arg17[%c4_156, %c0_157], %146 {strides = array<i32>} : memref<12x16xf32, #tpu.memory_space<vmem>>, vector<8x16xf32>,
    %c0_158 = arith.constant 0 : index
    %c0_159 = arith.constant 0 : index
    %150 = vector.load %arg17[%c0_158, %c0_159] : memref<12x16xf32, #tpu.memory_space<vmem>>, vector<8x16xf32>
    %c0_160 = arith.constant 0 : index
    %c0_161 = arith.constant 0 : index
    %151 = vector.load %arg18[%c0_160, %c0_161] : memref<128x72xf32, #tpu.memory_space<vmem>>, vector<8x16xf32>
    tpu.vector_store %arg18[%c0_160, %c0_161], %150 {strides = array<i32>} : memref<128x72xf32, #tpu.memory_space<vmem>>, vector<8x16xf32>,
    %c2_162 = arith.constant 2 : index
    %c0_163 = arith.constant 0 : index
    %152 = vector.load %arg17[%c2_162, %c0_163] : memref<12x16xf32, #tpu.memory_space<vmem>>, vector<8x16xf32>
    %c0_164 = arith.constant 0 : index
    %c16_165 = arith.constant 16 : index
    %153 = vector.load %arg18[%c0_164, %c16_165] : memref<128x72xf32, #tpu.memory_space<vmem>>, vector<8x16xf32>
    tpu.vector_store %arg18[%c0_164, %c16_165], %152 {strides = array<i32>} : memref<128x72xf32, #tpu.memory_space<vmem>>, vector<8x16xf32>,
    %c4_166 = arith.constant 4 : index
    %c0_167 = arith.constant 0 : index
    %154 = vector.load %arg17[%c4_166, %c0_167] : memref<12x16xf32, #tpu.memory_space<vmem>>, vector<8x16xf32>
    %c0_168 = arith.constant 0 : index
    %c32_169 = arith.constant 32 : index
    %155 = vector.load %arg18[%c0_168, %c32_169] : memref<128x72xf32, #tpu.memory_space<vmem>>, vector<8x16xf32>
    tpu.vector_store %arg18[%c0_168, %c32_169], %154 {strides = array<i32>} : memref<128x72xf32, #tpu.memory_space<vmem>>, vector<8x16xf32>,
    %c0_170 = arith.constant 0 : index
    %c0_171 = arith.constant 0 : index
    %156 = vector.load %arg18[%c0_170, %c0_171] : memref<128x72xf32, #tpu.memory_space<vmem>>, vector<8x48xf32>
    %157 = arith.truncf %156 : vector<8x48xf32> to vector<8x48xbf16>
    %cst_172 = arith.constant dense<0.000000e+00> : vector<8x8xf32>
    %158 = tpu.matmul %157, %126, %cst_172 {dimension_numbers = #tpu.dot_dimension_numbers<[1], [0], [0], [1], [0, 0, 1, 1], [], []>} : vector<8x48xbf16>, vector<48x8xbf16>, vector<8x8xf32> -> vector<8x8xf32>
    %159 = vector.broadcast %127 : vector<1x8xf32> to vector<8x8xf32>
    %160 = arith.addf %158, %159 : vector<8x8xf32>
    %161 = math.tanh %160 : vector<8x8xf32>
    %c0_173 = arith.constant 0 : index
    %c0_174 = arith.constant 0 : index
    %c0_175 = arith.constant 0 : index
    %162 = vector.load %arg13[%c0_173, %c0_174, %c0_175] : memref<1x8x8xf32, #tpu.memory_space<vmem>>, vector<1x8x8xf32>
    %163 = vector.shape_cast %162 : vector<1x8x8xf32> to vector<8x8xf32>
    %164 = vector.shape_cast %161 : vector<8x8xf32> to vector<1x8x8xf32>
    tpu.vector_store %arg13[%c0_173, %c0_174, %c0_175], %164 {strides = array<i32>} : memref<1x8x8xf32, #tpu.memory_space<vmem>>, vector<1x8x8xf32>,
    return
  }
  func.func @transform_0(%arg0: i32) -> (i32, i32, i32, i32) {
    %c0_i32 = arith.constant 0 : i32
    %c0_i32_0 = arith.constant 0 : i32
    %c0_i32_1 = arith.constant 0 : i32
    %c0_i32_2 = arith.constant 0 : i32
    return %arg0, %c0_i32, %c0_i32_0, %c0_i32_1 : i32, i32, i32, i32
  }
  func.func @transform_1(%arg0: i32) -> (i32, i32) {
    %c0_i32 = arith.constant 0 : i32
    %c0_i32_0 = arith.constant 0 : i32
    %c0_i32_1 = arith.constant 0 : i32
    return %c0_i32, %c0_i32_0 : i32, i32
  }
  func.func @transform_2(%arg0: i32) -> (i32, i32) {
    %c0_i32 = arith.constant 0 : i32
    %c0_i32_0 = arith.constant 0 : i32
    %c0_i32_1 = arith.constant 0 : i32
    return %c0_i32, %c0_i32_0 : i32, i32
  }
  func.func @transform_3(%arg0: i32) -> (i32, i32) {
    %c0_i32 = arith.constant 0 : i32
    %c0_i32_0 = arith.constant 0 : i32
    %c0_i32_1 = arith.constant 0 : i32
    return %c0_i32, %c0_i32_0 : i32, i32
  }
  func.func @transform_4(%arg0: i32) -> (i32, i32) {
    %c0_i32 = arith.constant 0 : i32
    %c0_i32_0 = arith.constant 0 : i32
    %c0_i32_1 = arith.constant 0 : i32
    return %c0_i32, %c0_i32_0 : i32, i32
  }
  func.func @transform_5(%arg0: i32) -> (i32, i32) {
    %c0_i32 = arith.constant 0 : i32
    %c0_i32_0 = arith.constant 0 : i32
    %c0_i32_1 = arith.constant 0 : i32
    return %c0_i32, %c0_i32_0 : i32, i32
  }
  func.func @transform_6(%arg0: i32) -> (i32, i32) {
    %c0_i32 = arith.constant 0 : i32
    %c0_i32_0 = arith.constant 0 : i32
    %c0_i32_1 = arith.constant 0 : i32
    return %c0_i32, %c0_i32_0 : i32, i32
  }
  func.func @transform_7(%arg0: i32) -> (i32, i32) {
    %c0_i32 = arith.constant 0 : i32
    %c0_i32_0 = arith.constant 0 : i32
    %c0_i32_1 = arith.constant 0 : i32
    return %c0_i32, %c0_i32_0 : i32, i32
  }
  func.func @transform_8(%arg0: i32) -> (i32, i32) {
    %c0_i32 = arith.constant 0 : i32
    %c0_i32_0 = arith.constant 0 : i32
    %c0_i32_1 = arith.constant 0 : i32
    return %c0_i32, %c0_i32_0 : i32, i32
  }
  func.func @transform_9(%arg0: i32) -> (i32, i32) {
    %c0_i32 = arith.constant 0 : i32
    %c0_i32_0 = arith.constant 0 : i32
    %c0_i32_1 = arith.constant 0 : i32
    return %c0_i32, %c0_i32_0 : i32, i32
  }
  func.func @transform_10(%arg0: i32) -> (i32, i32) {
    %c0_i32 = arith.constant 0 : i32
    %c0_i32_0 = arith.constant 0 : i32
    %c0_i32_1 = arith.constant 0 : i32
    return %c0_i32, %c0_i32_0 : i32, i32
  }
  func.func @transform_11(%arg0: i32) -> (i32, i32) {
    %c0_i32 = arith.constant 0 : i32
    %c0_i32_0 = arith.constant 0 : i32
    %c0_i32_1 = arith.constant 0 : i32
    return %c0_i32, %c0_i32_0 : i32, i32
  }
  func.func @transform_12(%arg0: i32) -> (i32, i32, i32) {
    %c0_i32 = arith.constant 0 : i32
    %c0_i32_0 = arith.constant 0 : i32
    %c0_i32_1 = arith.constant 0 : i32
    return %arg0, %c0_i32, %c0_i32_0 : i32, i32, i32
  }
}

</mosaic_0001>

<bundles_post_ra>
// kernel: cnn2d_forward.1
= control target key start
LH: loop header
LB: loop body
LE: loop exit
PB: predicated region body
PF: predicated region fallthrough
CT: control target
= control target key end

     0   :  { %s3445_s23 = smov 0   ;;  %s4190_s0 = inlined_call_operand.vmem [shape: f32[2,8,16,4], index: 0, kind: input, shape index: {}]   ;;  %s4191_s1 = inlined_call_operand.vmem [shape: bf16[36,8], index: 1, kind: input, shape index: {}]   ;;  %s4192_s2 = inlined_call_operand.vmem [shape: f32[1,8], index: 2, kind: input, shape index: {}]   ;;  %s4193_s3 = inlined_call_operand.vmem [shape: f32[1,8], index: 3, kind: input, shape index: {}]   ;;  %s4194_s4 = inlined_call_operand.vmem [shape: bf16[72,8], index: 4, kind: input, shape index: {}]   ;;  %s4195_s5 = inlined_call_operand.vmem [shape: f32[1,8], index: 5, kind: input, shape index: {}]   ;;  %s4196_s6 = inlined_call_operand.vmem [shape: f32[1,8], index: 6, kind: input, shape index: {}]   ;;  %s4197_s7 = inlined_call_operand.vmem [shape: bf16[24,16], index: 7, kind: input, shape index: {}]   ;;  %s4198_s8 = inlined_call_operand.vmem [shape: f32[1,16], index: 8, kind: input, shape index: {}]   ;;  %s4199_s9 = inlined_call_operand.<no memory space> [shape: f32[1,1], index: 9, kind: input, shape index: {}]   ;;  %s4200_s10 = inlined_call_operand.vmem [shape: bf16[48,8], index: 10, kind: input, shape index: {}]   ;;  %s4201_s11 = inlined_call_operand.vmem [shape: f32[1,8], index: 11, kind: input, shape index: {}]   ;;  %s4202_s12 = inlined_call_operand.vmem [shape: f32[2,8,8], index: 12, kind: output, shape index: {}]  }
   0x1   :  { %v17_v0 = vstv %s4199_s9 }
   0x2   :  { %18 = vst [vmem:[#allocation7] sm:$0x1] %v17_v0 }
   0x3 LB: > { %s3035_s24 = sadd.s32 4294967295, %s3360_s23   ;;  %p3039_p0 = scmp.ge.s32.totalorder %s3360_s23, 1  ;;  %s3360_s23 = sphi %s3445_s23, %s24_s23  }
   0x4   : > { %p364_p1 = scmp.lt.s32.totalorder %s3360_s23, 3 }
   0x6   : > { %p365_p2 = pnand %p3039_p0, %p364_p1 }
   0x7   : > { %vm438_vm0 = vcmask (!%p365_p2), 31744   ;;  %vm441_vm1 = vcmask (!%p365_p2), 25600   ;;  %v3362_v1 = vmov (!%p365_p2), 0.0   ;;  %p405_p3 = scmp.lt.s32.totalorder (!%p365_p2), %s3035_s24, 1  ;;  %vm463_vm2 = vcmask (!%p365_p2), 25601   ;;  %s3363_s28 = smov (!%p365_p2), 4  }
   0x8   : > { %368 = sbr.rel (%p365_p2) target bundleno = 1742 (0x6ce), region = 68  ;;  %443 = vst.msk [vmem:[#allocation2 + $0x18] sm:$0xff] (!%p365_p2), %vm438_vm0, %v3362_v1  ;;  %444 = vst.msk [vmem:[#allocation2 + $0x20] sm:$0xff] (!%p365_p2), %vm438_vm0, %v3362_v1  ;;  %vm472_vm3 = vcmask (!%p365_p2), 30726   ;;  %s3364_s29 = smov (!%p365_p2), 8   ;;  %v3303_v42 = vld [vmem:[%s4191_s1] sm:$0xff] (!%p365_p2)  }
   0x9   : > { %439 = vst.msk [vmem:[#allocation2] sm:$0xff] (!%p365_p2), %vm438_vm0, %v3362_v1  ;;  %440 = vst.msk [vmem:[#allocation2 + $0x8] sm:$0xff] (!%p365_p2), %vm438_vm0, %v3362_v1  ;;  %s3365_s30 = smov (!%p365_p2), 12   ;;  %s3366_s13 = smov (!%p365_p2), 16   ;;  %3223 = vmatprep.subr.bf16.mxu0 (!%p365_p2), %v3303_v42  ;;  %v3304_v45 = vld [vmem:[%s4191_s1 + $0x8] sm:$0xff] (!%p365_p2)   ;;  %vm1360_vm4 = vcmask (!%p365_p2), 1041408  }
   0xa   : > { %445 = vst.msk [vmem:[#allocation2 + $0x28] sm:$0x3] (!%p365_p2), %vm441_vm1, %v3362_v1  ;;  %442 = vst.msk [vmem:[#allocation2 + $0x10] sm:$0x3] (!%p365_p2), %vm441_vm1, %v3362_v1  ;;  %s3367_s14 = smov (!%p365_p2), 20   ;;  %s3368_s15 = smov (!%p365_p2), 24   ;;  %3224 = vmatpush3.bf16.msra.mxu0 (!%p365_p2), %v3303_v42 }
   0xb   : > { %s3369_s18 = smov (!%p365_p2), 28   ;;  %3225 = vmatprep.subr.bf16.mxu0 (!%p365_p2), %v3304_v45  ;;  %v3305_v46 = vld [vmem:[%s4191_s1 + $0x10] ss:$0 sps:$4 sm:$0x33] (!%p365_p2)   ;;  %vm593_vm5 = vcmask (!%p365_p2), 64544   ;;  %vm690_vm6 = vcmask (!%p365_p2), 97344  }
   0xc   : > { %v1362_v47 = vsel (!%p365_p2), %vm1360_vm4, %v3305_v46, 0  ;;  %vm788_vm7 = vcmask (!%p365_p2), 130144   ;;  %vm885_vm8 = vcmask (!%p365_p2), 162944   ;;  %vm982_vm9 = vcmask (!%p365_p2), 195744   ;;  %s3373_s16 = smov (!%p365_p2), 56   ;;  %s3374_s17 = smov (!%p365_p2), 64  }
   0xd   : > { %vm1079_vm10 = vcmask (!%p365_p2), 228544   ;;  %vm1176_vm11 = vcmask (!%p365_p2), 261344   ;;  %vm1273_vm12 = vcmask (!%p365_p2), 294144   ;;  %vm1335_vm13 = vcmask (!%p365_p2), 293888  }
   0xe   : > { %3226 = vmatpush3.bf16.msra.mxu0 (!%p365_p2), %v3304_v45  ;;  %vm2157_vm14 = vcmask (!%p365_p2), 60416   ;;  %vm1958_vm15 = vcmask (!%p365_p2), 62464  }
   0xf   : > { %s4212_s24 = smov (!%p405_p3, %s3035_s24), 1  ;;  %v3474_v5 = vld [vmem:[#allocation2 + $0x19] sm:$0xff]  ;;  %3277 = vmatprep.subr.msk.bf16.mxu0 %vm1360_vm4, %v3305_v46  ;;  %2746 = vst.msk [vmem:[#allocation4] sm:$0xf] %vm2157_vm14, %v3362_v1  ;;  %vm2121_vm4 = vcmask 1041409  }
  0x10   : > { %s3197_s9 = sshll.u32 %s4212_s24, 7  ;;  %v513_v6 = vld [vmem:[#allocation2 + $0x1] sm:$0xff]  ;;  %549 = vrot.lane.b32.xlu1 %v3474_v5, %s3363_s28  ;;  %v708_v10 = vld [vmem:[#allocation2 + $0x18] sm:$0xff]  ;;  %1959 = vst.msk [vmem:[#allocation3] sm:$0x3f] %vm1958_vm15, %v3362_v1 }
  0x11   : > { %s3469_s27 = scalar_lea.vmem %s4190_s0, %s3197_s9  ;;  %545 = vrot.lane.b32.xlu0 %v513_v6, %s3363_s28  ;;  %v3485_v7 = vld [vmem:[#allocation2 + $0x21] sm:$0xff]  ;;  %v514_v8 = vld [vmem:[#allocation2 + $0x9] sm:$0xff]  ;;  %499 = vst.msk [vmem:[#allocation6 + $0x10] sm:$0xff] %vm438_vm0, %v708_v10  ;;  %s3370_s9 = smov 32  }
  0x12   : > { %v415_v2 = vld [vmem:[%s3469_s27] sm:$0xff]  ;;  %v416_v3 = vld [vmem:[%s3469_s27 + $0x8] sm:$0xff]  ;;  %v417_v4 = vld [vmem:[%s3469_s27 + $0x10] sm:$0xff]  ;;  %3228 = vmatpush3.bf16.msra.mxu0 %v1362_v47  ;;  %1960 = vst.msk [vmem:[#allocation3 + $0x8] sm:$0x3f] %vm1958_vm15, %v3362_v1 }
  0x13   : > { %447 = vst.msk [vmem:[#allocation2 + $0x31] sm:$0xff] %vm438_vm0, %v415_v2  ;;  %448 = vst.msk [vmem:[#allocation2 + $0x39] sm:$0xff] %vm438_vm0, %v416_v3  ;;  %v709_v9 = vld [vmem:[#allocation2 + $0x20] sm:$0xff]  ;;  %v418_v11 = vld [vmem:[%s3469_s27 + $0x18] sm:$0xff] }
  0x14   : > { %464 = vst.msk [vmem:[#allocation2 + $0x2f] sm:$0x2] %vm463_vm2, %v415_v2  ;;  %465 = vst.msk [vmem:[#allocation2 + $0x47] sm:$0x2] %vm463_vm2, %v417_v4  ;;  %v419_v12 = vld [vmem:[%s3469_s27 + $0x20] sm:$0xff]  ;;  %v611_v13 = vld [vmem:[#allocation2 + $0xa] sm:$0xff]  ;;  %551 = vrot.lane.b32.xlu1 %v3485_v7, %s3363_s28 }
  0x15   : > { %473 = vst.msk [vmem:[#allocation2 + $0x3b] sm:$0x40] %vm472_vm3, %v416_v3  ;;  %v610_v14 = vld [vmem:[#allocation2 + $0x2] sm:$0xff]  ;;  %474 = vst.msk [vmem:[#allocation2 + $0x53] sm:$0x40] %vm472_vm3, %v418_v11  ;;  %v421_v16 = vld [vmem:[%s3469_s27 + $0x30] sm:$0xff]  ;;  %547 = vrot.lane.b32.xlu0 %v514_v8, %s3363_s28 }
  0x16   : > { %449 = vst.msk [vmem:[#allocation2 + $0x49] sm:$0xff] %vm438_vm0, %v417_v4  ;;  %500 = vst.msk [vmem:[#allocation6 + $0x18] sm:$0xff] %vm438_vm0, %v709_v9  ;;  %v420_v15 = vld [vmem:[%s3469_s27 + $0x28] sm:$0xff]  ;;  %v422_v17 = vld [vmem:[%s3469_s27 + $0x38] sm:$0xff] }
  0x17   : > { %450 = vst.msk [vmem:[#allocation2 + $0x51] sm:$0xff] %vm438_vm0, %v418_v11  ;;  %451 = vst.msk [vmem:[#allocation2 + $0x61] sm:$0xff] %vm438_vm0, %v419_v12  ;;  %v481_v18 = vld [vmem:[#allocation2] sm:$0xff]  ;;  %v482_v19 = vld [vmem:[#allocation2 + $0x8] sm:$0xff] }
  0x18   : > { %466 = vst.msk [vmem:[#allocation2 + $0x5f] sm:$0x2] %vm463_vm2, %v419_v12  ;;  %467 = vst.msk [vmem:[#allocation2 + $0x77] sm:$0x2] %vm463_vm2, %v421_v16  ;;  %v613_v22 = vld [vmem:[#allocation2 + $0x22] sm:$0xff]  ;;  %644 = vrot.lane.b32.xlu1 %v611_v13, %s3364_s29  ;;  %v612_v23 = vld [vmem:[#allocation2 + $0x1a] sm:$0xff] }
  0x19   : > { %452 = vst.msk [vmem:[#allocation2 + $0x69] sm:$0xff] %vm438_vm0, %v420_v15  ;;  %453 = vst.msk [vmem:[#allocation2 + $0x79] sm:$0xff] %vm438_vm0, %v421_v16  ;;  %642 = vrot.lane.b32.xlu0 %v610_v14, %s3364_s29  ;;  %v423_v30 = vld [vmem:[%s3469_s27 + $0x40] sm:$0xff]  ;;  %v424_v31 = vld [vmem:[%s3469_s27 + $0x48] sm:$0xff] }
  0x1a   : > { %475 = vst.msk [vmem:[#allocation2 + $0x6b] sm:$0x40] %vm472_vm3, %v420_v15  ;;  %476 = vst.msk [vmem:[#allocation2 + $0x83] sm:$0x40] %vm472_vm3, %v422_v17  ;;  %v711_v20 = vld [vmem:[#allocation2 + $0x38] sm:$0xff]  ;;  %v425_v38 = vld [vmem:[%s3469_s27 + $0x50] sm:$0xff] }
  0x1b   : > { %454 = vst.msk [vmem:[#allocation2 + $0x81] sm:$0xff] %vm438_vm0, %v422_v17  ;;  %497 = vst.msk [vmem:[#allocation6] sm:$0xff] %vm438_vm0, %v481_v18  ;;  %v710_v21 = vld [vmem:[#allocation2 + $0x30] sm:$0xff]  ;;  %v808_v34 = vld [vmem:[#allocation2 + $0x39] sm:$0xff] }
  0x1c   : > { %498 = vst.msk [vmem:[#allocation6 + $0x8] sm:$0xff] %vm438_vm0, %v482_v19  ;;  %502 = vst.msk [vmem:[#allocation6 + $0x28] sm:$0xff] %vm438_vm0, %v711_v20  ;;  %648 = vrot.lane.b32.xlu1 %v613_v22, %s3364_s29  ;;  %v807_v35 = vld [vmem:[#allocation2 + $0x31] sm:$0xff]  ;;  %v905_v36 = vld [vmem:[#allocation2 + $0x3a] sm:$0xff] }
  0x1d   : > { %501 = vst.msk [vmem:[#allocation6 + $0x20] sm:$0xff] %vm438_vm0, %v710_v21  ;;  %v3513_v24 = vld [vmem:[#allocation2 + $0x48] sm:$0xff]  ;;  %646 = vrot.lane.b32.xlu0 %v612_v23, %s3364_s29  ;;  %455 = vst.msk [vmem:[#allocation2 + $0x91] sm:$0xff] %vm438_vm0, %v423_v30  ;;  %v904_v37 = vld [vmem:[#allocation2 + $0x32] sm:$0xff] }
  0x1e   : > { %503 = vst.msk [vmem:[#allocation6 + $0x30] sm:$0xff] %vm438_vm0, %v3513_v24  ;;  %v3517_v25 = vld [vmem:[#allocation2 + $0x50] sm:$0xff]  ;;  %456 = vst.msk [vmem:[#allocation2 + $0x99] sm:$0xff] %vm438_vm0, %v424_v31  ;;  %v426_v39 = vld [vmem:[%s3469_s27 + $0x58] sm:$0xff] }
  0x1f   : > { %v3521_v27 = vld [vmem:[#allocation2 + $0x60] sm:$0xff]  ;;  %504 = vst.msk [vmem:[#allocation6 + $0x38] sm:$0xff] %vm438_vm0, %v3517_v25  ;;  %457 = vst.msk [vmem:[#allocation2 + $0xa9] sm:$0xff] %vm438_vm0, %v425_v38  ;;  %v1099_v43 = vld [vmem:[#allocation2 + $0x51] sm:$0xff] }
  0x20   : > { %v3519_v26 = vld [vmem:[#allocation2 + $0x68] sm:$0xff]  ;;  %505 = vst.msk [vmem:[#allocation6 + $0x40] sm:$0xff] %vm438_vm0, %v3521_v27  ;;  %v3533_v29 = vld [vmem:[#allocation2 + $0x78] sm:$0xff]  ;;  %742 = vrot.lane.b32.xlu1 %v709_v9, %s3365_s30  ;;  %458 = vst.msk [vmem:[#allocation2 + $0xb1] sm:$0xff] %vm438_vm0, %v426_v39 }
  0x21   : > { %506 = vst.msk [vmem:[#allocation6 + $0x48] sm:$0xff] %vm438_vm0, %v3519_v26  ;;  %507 = vst.msk [vmem:[#allocation6 + $0x50] sm:$0xff] %vm438_vm0, %v3533_v29  ;;  %740 = vrot.lane.b32.xlu0 %v708_v10, %s3365_s30  ;;  %v1098_v44 = vld [vmem:[#allocation2 + $0x49] sm:$0xff]  ;;  %v1196_v48 = vld [vmem:[#allocation2 + $0x52] sm:$0xff] }
  0x22   : > { %v3531_v28 = vld [vmem:[#allocation2 + $0x80] sm:$0xff]  ;;  %468 = vst.msk [vmem:[#allocation2 + $0x8f] sm:$0x2] %vm463_vm2, %v423_v30  ;;  %469 = vst.msk [vmem:[#allocation2 + $0xa7] sm:$0x2] %vm463_vm2, %v425_v38  ;;  %v1195_v49 = vld [vmem:[#allocation2 + $0x4a] sm:$0xff] }
  0x23   : > { %508 = vst.msk [vmem:[#allocation6 + $0x58] sm:$0xff] %vm438_vm0, %v3531_v28  ;;  %v427_v50 = vld [vmem:[%s3469_s27 + $0x60] sm:$0xff]  ;;  %v428_v51 = vld [vmem:[%s3469_s27 + $0x68] sm:$0xff]  ;;  %v429_v56 = vld [vmem:[%s3469_s27 + $0x70] sm:$0xff] }
  0x24   : > { %477 = vst.msk [vmem:[#allocation2 + $0x9b] sm:$0x40] %vm472_vm3, %v424_v31  ;;  %746 = vrot.lane.b32.xlu1 %v711_v20, %s3365_s30  ;;  %478 = vst.msk [vmem:[#allocation2 + $0xb3] sm:$0x40] %vm472_vm3, %v426_v39  ;;  %v812_v52 = vld [vmem:[#allocation2 + $0x69] sm:$0xff]  ;;  %v811_v53 = vld [vmem:[#allocation2 + $0x61] sm:$0xff] }
  0x25   : > { %744 = vrot.lane.b32.xlu0 %v710_v21, %s3365_s30  ;;  %v3549_v32 = vld [vmem:[#allocation2 + $0x98] sm:$0xff]  ;;  %459 = vst.msk [vmem:[#allocation2 + $0xc1] sm:$0xff] %vm438_vm0, %v427_v50  ;;  %460 = vst.msk [vmem:[#allocation2 + $0xc9] sm:$0xff] %vm438_vm0, %v428_v51  ;;  %v909_v54 = vld [vmem:[#allocation2 + $0x6a] sm:$0xff] }
  0x26   : > { %510 = vst.msk [vmem:[#allocation6 + $0x68] sm:$0xff] %vm438_vm0, %v3549_v32  ;;  %v908_v55 = vld [vmem:[#allocation2 + $0x62] sm:$0xff]  ;;  %v430_v57 = vld [vmem:[%s3469_s27 + $0x78] sm:$0xff]  ;;  %461 = vst.msk [vmem:[#allocation2 + $0xd9] sm:$0xff] %vm438_vm0, %v429_v56 }
  0x27   : > { %v3581_v41 = vld [vmem:[#allocation2 + $0xb0] sm:$0xff]  ;;  %470 = vst.msk [vmem:[#allocation2 + $0xbf] sm:$0x2] %vm463_vm2, %v427_v50  ;;  %471 = vst.msk [vmem:[#allocation2 + $0xd7] sm:$0x2] %vm463_vm2, %v429_v56  ;;  %v3650_v58 = vld [vmem:[#allocation2 + $0x81] sm:$0xff] }
  0x28   : > { %839 = vrot.lane.b32.xlu1 %v3485_v7, %s3366_s13  ;;  %512 = vst.msk [vmem:[#allocation6 + $0x78] sm:$0xff] %vm438_vm0, %v3581_v41  ;;  %462 = vst.msk [vmem:[#allocation2 + $0xe1] sm:$0xff] %vm438_vm0, %v430_v57  ;;  %v3652_v59 = vld [vmem:[#allocation2 + $0x79] sm:$0xff]  ;;  %v1200_v3 = vld [vmem:[#allocation2 + $0x82] sm:$0xff] }
  0x29   : > { %v3551_v33 = vld [vmem:[#allocation2 + $0x90] sm:$0xff]  ;;  %837 = vrot.lane.b32.xlu0 %v3474_v5, %s3366_s13  ;;  %v3575_v40 = vld [vmem:[#allocation2 + $0xa8] sm:$0xff]  ;;  %479 = vst.msk [vmem:[#allocation2 + $0xcb] sm:$0x40] %vm472_vm3, %v428_v51  ;;  %480 = vst.msk [vmem:[#allocation2 + $0xe3] sm:$0x40] %vm472_vm3, %v430_v57 }
  0x2a   : > { %509 = vst.msk [vmem:[#allocation6 + $0x60] sm:$0xff] %vm438_vm0, %v3551_v33  ;;  %511 = vst.msk [vmem:[#allocation6 + $0x70] sm:$0xff] %vm438_vm0, %v3575_v40  ;;  %v1199_v4 = vld [vmem:[#allocation2 + $0x7a] sm:$0xff]  ;;  %vm2166_vm3 = vcmask 57344  }
  0x2b   : > { %v3704_v19 = vld [vmem:[#allocation2 + $0x99] sm:$0xff] }
  0x2c   : > { %843 = vrot.lane.b32.xlu1 %v808_v34, %s3366_s13  ;;  %v1204_v51 = vld [vmem:[#allocation2 + $0xb2] sm:$0xff] }
  0x2d   : > { %841 = vrot.lane.b32.xlu0 %v807_v35, %s3366_s13 }
  0x30   : > { %936 = vrot.lane.b32.xlu1 %v613_v22, %s3367_s14 }
  0x31   : > { %934 = vrot.lane.b32.xlu0 %v612_v23, %s3367_s14 }
  0x34   : > { %940 = vrot.lane.b32.xlu1 %v905_v36, %s3367_s14 }
  0x35   : > { %938 = vrot.lane.b32.xlu0 %v904_v37, %s3367_s14 }
  0x38   : > { %1033 = vrot.lane.b32.xlu1 %v711_v20, %s3368_s15  ;;  %v3706_v20 = vld [vmem:[#allocation2 + $0x91] sm:$0xff] }
  0x39   : > { %1031 = vrot.lane.b32.xlu0 %v710_v21, %s3368_s15 }
  0x3c   : > { %1037 = vrot.lane.b32.xlu1 %v3517_v25, %s3368_s15 }
  0x3d   : > { %1035 = vrot.lane.b32.xlu0 %v3513_v24, %s3368_s15 }
  0x40   : > { %1130 = vrot.lane.b32.xlu1 %v808_v34, %s3369_s18 }
  0x41   : > { %1128 = vrot.lane.b32.xlu0 %v807_v35, %s3369_s18 }
  0x44   : > { %1134 = vrot.lane.b32.xlu1 %v1099_v43, %s3369_s18 }
  0x45   : > { %1132 = vrot.lane.b32.xlu0 %v1098_v44, %s3369_s18 }
  0x48   : > { %1227 = vrot.lane.b32.xlu1 %v905_v36, %s3370_s9 }
  0x49   : > { %1225 = vrot.lane.b32.xlu0 %v904_v37, %s3370_s9 }
  0x4c   : > { %555 = vrot.lane.b32.xlu1 %v808_v34, %s3363_s28 }
  0x4d   : > { %553 = vrot.lane.b32.xlu0 %v807_v35, %s3363_s28 }
  0x50   : > { %1231 = vrot.lane.b32.xlu1 %v1196_v48, %s3370_s9 }
  0x51   : > { %1229 = vrot.lane.b32.xlu0 %v1195_v49, %s3370_s9 }
  0x54   : > { %559 = vrot.lane.b32.xlu1 %v1099_v43, %s3363_s28 }
  0x55   : > { %557 = vrot.lane.b32.xlu0 %v1098_v44, %s3363_s28 }
  0x58   : > { %652 = vrot.lane.b32.xlu1 %v905_v36, %s3364_s29 }
  0x59   : > { %650 = vrot.lane.b32.xlu0 %v904_v37, %s3364_s29 }
  0x5c   : > { %656 = vrot.lane.b32.xlu1 %v1196_v48, %s3364_s29 }
  0x5d   : > { %654 = vrot.lane.b32.xlu0 %v1195_v49, %s3364_s29 }
  0x60   : > { %750 = vrot.lane.b32.xlu1 %v3517_v25, %s3365_s30  ;;  %v3718_v25 = vld [vmem:[#allocation2 + $0x9a] sm:$0xff] }
  0x61   : > { %748 = vrot.lane.b32.xlu0 %v3513_v24, %s3365_s30 }
  0x64   : > { %754 = vrot.lane.b32.xlu1 %v3519_v26, %s3365_s30 }
  0x65   : > { %752 = vrot.lane.b32.xlu0 %v3521_v27, %s3365_s30 }
  0x68   : > { %847 = vrot.lane.b32.xlu1 %v1099_v43, %s3366_s13 }
  0x69   : > { %845 = vrot.lane.b32.xlu0 %v1098_v44, %s3366_s13 }
  0x6c   : > { %851 = vrot.lane.b32.xlu1 %v812_v52, %s3366_s13 }
  0x6d   : > { %849 = vrot.lane.b32.xlu0 %v811_v53, %s3366_s13 }
  0x70   : > { %944 = vrot.lane.b32.xlu1 %v1196_v48, %s3367_s14 }
  0x71   : > { %942 = vrot.lane.b32.xlu0 %v1195_v49, %s3367_s14 }
  0x74   : > { %948 = vrot.lane.b32.xlu1 %v909_v54, %s3367_s14 }
  0x75   : > { %946 = vrot.lane.b32.xlu0 %v908_v55, %s3367_s14 }
  0x78   : > { %1041 = vrot.lane.b32.xlu1 %v3519_v26, %s3368_s15  ;;  %v3720_v26 = vld [vmem:[#allocation2 + $0x92] sm:$0xff] }
  0x79   : > { %1039 = vrot.lane.b32.xlu0 %v3521_v27, %s3368_s15 }
  0x7c   : > { %1045 = vrot.lane.b32.xlu1 %v3531_v28, %s3368_s15 }
  0x7d   : > { %1043 = vrot.lane.b32.xlu0 %v3533_v29, %s3368_s15 }
  0x80   : > { %1138 = vrot.lane.b32.xlu1 %v812_v52, %s3369_s18 }
  0x81   : > { %1136 = vrot.lane.b32.xlu0 %v811_v53, %s3369_s18 }
  0x82   : > { %v550_v60 = vpop.permute.xlu1 %549 }
  0x83   : > { %v546_v61 = vpop.permute.xlu0 %545  ;;  %596 = vst.msk [vmem:[#allocation6 + $0x10] sm:$0xff] %vm593_vm5, %v550_v60 }
  0x84   : > { %594 = vst.msk [vmem:[#allocation6] sm:$0xff] %vm593_vm5, %v546_v61  ;;  %1142 = vrot.lane.b32.xlu1 %v3650_v58, %s3369_s18 }
  0x85   : > { %1140 = vrot.lane.b32.xlu0 %v3652_v59, %s3369_s18 }
  0x86   : > { %v552_v62 = vpop.permute.xlu1 %551 }
  0x87   : > { %v548_v63 = vpop.permute.xlu0 %547  ;;  %597 = vst.msk [vmem:[#allocation6 + $0x18] sm:$0xff] %vm593_vm5, %v552_v62 }
  0x88   : > { %595 = vst.msk [vmem:[#allocation6 + $0x8] sm:$0xff] %vm593_vm5, %v548_v63  ;;  %1235 = vrot.lane.b32.xlu1 %v909_v54, %s3370_s9  ;;  %v723_v63 = vld [vmem:[#allocation2 + $0xc8] sm:$0xff] }
  0x89   : > { %1233 = vrot.lane.b32.xlu0 %v908_v55, %s3370_s9 }
  0x8a   : > { %v645_v0 = vpop.permute.xlu1 %644 }
  0x8b   : > { %v643_v2 = vpop.permute.xlu0 %642  ;;  %692 = vst.msk [vmem:[#allocation6 + $0x8] sm:$0xff] %vm690_vm6, %v645_v0  ;;  %v722_v0 = vld [vmem:[#allocation2 + $0xc0] sm:$0xff] }
  0x8c   : > { %691 = vst.msk [vmem:[#allocation6] sm:$0xff] %vm690_vm6, %v643_v2  ;;  %563 = vrot.lane.b32.xlu1 %v812_v52, %s3363_s28  ;;  %v1203_v52 = vld [vmem:[#allocation2 + $0xaa] sm:$0xff] }
  0x8d   : > { %561 = vrot.lane.b32.xlu0 %v811_v53, %s3363_s28 }
  0x8e   : > { %v649_v5 = vpop.permute.xlu1 %648 }
  0x8f   : > { %v647_v6 = vpop.permute.xlu0 %646  ;;  %694 = vst.msk [vmem:[#allocation6 + $0x18] sm:$0xff] %vm690_vm6, %v649_v5 }
  0x90   : > { %693 = vst.msk [vmem:[#allocation6 + $0x10] sm:$0xff] %vm690_vm6, %v647_v6  ;;  %1239 = vrot.lane.b32.xlu1 %v1200_v3, %s3370_s9 }
  0x91   : > { %1237 = vrot.lane.b32.xlu0 %v1199_v4, %s3370_s9 }
  0x92   : > { %v743_v7 = vpop.permute.xlu1 %742 }
  0x93   : > { %v741_v8 = vpop.permute.xlu0 %740  ;;  %790 = vst.msk [vmem:[#allocation6 + $0x8] sm:$0xff] %vm788_vm7, %v743_v7 }
  0x94   : > { %789 = vst.msk [vmem:[#allocation6] sm:$0xff] %vm788_vm7, %v741_v8  ;;  %567 = vrot.lane.b32.xlu1 %v3650_v58, %s3363_s28 }
  0x95   : > { %565 = vrot.lane.b32.xlu0 %v3652_v59, %s3363_s28 }
  0x96   : > { %v747_v9 = vpop.permute.xlu1 %746 }
  0x97   : > { %v745_v10 = vpop.permute.xlu0 %744  ;;  %792 = vst.msk [vmem:[#allocation6 + $0x18] sm:$0xff] %vm788_vm7, %v747_v9 }
  0x98   : > { %791 = vst.msk [vmem:[#allocation6 + $0x10] sm:$0xff] %vm788_vm7, %v745_v10  ;;  %660 = vrot.lane.b32.xlu1 %v909_v54, %s3364_s29  ;;  %v917_v10 = vld [vmem:[#allocation2 + $0xca] sm:$0xff] }
  0x99   : > { %658 = vrot.lane.b32.xlu0 %v908_v55, %s3364_s29 }
  0x9a   : > { %v840_v11 = vpop.permute.xlu1 %839 }
  0x9b   : > { %v838_v12 = vpop.permute.xlu0 %837  ;;  %887 = vst.msk [vmem:[#allocation6 + $0x8] sm:$0xff] %vm885_vm8, %v840_v11  ;;  %v916_v11 = vld [vmem:[#allocation2 + $0xc2] sm:$0xff] }
  0x9c   : > { %886 = vst.msk [vmem:[#allocation6] sm:$0xff] %vm885_vm8, %v838_v12  ;;  %664 = vrot.lane.b32.xlu1 %v1200_v3, %s3364_s29 }
  0x9d   : > { %662 = vrot.lane.b32.xlu0 %v1199_v4, %s3364_s29 }
  0x9e   : > { %v844_v13 = vpop.permute.xlu1 %843 }
  0x9f   : > { %v842_v14 = vpop.permute.xlu0 %841  ;;  %889 = vst.msk [vmem:[#allocation6 + $0x18] sm:$0xff] %vm885_vm8, %v844_v13 }
  0xa0   : > { %888 = vst.msk [vmem:[#allocation6 + $0x10] sm:$0xff] %vm885_vm8, %v842_v14  ;;  %758 = vrot.lane.b32.xlu1 %v3531_v28, %s3365_s30 }
  0xa1   : > { %756 = vrot.lane.b32.xlu0 %v3533_v29, %s3365_s30 }
  0xa2   : > { %v937_v15 = vpop.permute.xlu1 %936 }
  0xa3   : > { %v935_v16 = vpop.permute.xlu0 %934  ;;  %984 = vst.msk [vmem:[#allocation6 + $0x8] sm:$0xff] %vm982_vm9, %v937_v15 }
  0xa4   : > { %983 = vst.msk [vmem:[#allocation6] sm:$0xff] %vm982_vm9, %v935_v16  ;;  %762 = vrot.lane.b32.xlu1 %v3549_v32, %s3365_s30  ;;  %v1014_v16 = vld [vmem:[#allocation2 + $0xe0] sm:$0xff] }
  0xa5   : > { %760 = vrot.lane.b32.xlu0 %v3551_v33, %s3365_s30 }
  0xa6   : > { %v941_v17 = vpop.permute.xlu1 %940 }
  0xa7   : > { %v939_v18 = vpop.permute.xlu0 %938  ;;  %986 = vst.msk [vmem:[#allocation6 + $0x18] sm:$0xff] %vm982_vm9, %v941_v17  ;;  %v1013_v17 = vld [vmem:[#allocation2 + $0xd8] sm:$0xff] }
  0xa8   : > { %985 = vst.msk [vmem:[#allocation6 + $0x10] sm:$0xff] %vm982_vm9, %v939_v18  ;;  %855 = vrot.lane.b32.xlu1 %v3650_v58, %s3366_s13 }
  0xa9   : > { %853 = vrot.lane.b32.xlu0 %v3652_v59, %s3366_s13 }
  0xaa   : > { %v1034_v21 = vpop.permute.xlu1 %1033 }
  0xab   : > { %v1032_v22 = vpop.permute.xlu0 %1031  ;;  %1081 = vst.msk [vmem:[#allocation6 + $0x8] sm:$0xff] %vm1079_vm10, %v1034_v21 }
  0xac   : > { %1080 = vst.msk [vmem:[#allocation6] sm:$0xff] %vm1079_vm10, %v1032_v22  ;;  %859 = vrot.lane.b32.xlu1 %v3704_v19, %s3366_s13  ;;  %v1111_v22 = vld [vmem:[#allocation2 + $0xe1] sm:$0xff] }
  0xad   : > { %857 = vrot.lane.b32.xlu0 %v3706_v20, %s3366_s13 }
  0xae   : > { %v1038_v23 = vpop.permute.xlu1 %1037 }
  0xaf   : > { %v1036_v24 = vpop.permute.xlu0 %1035  ;;  %1083 = vst.msk [vmem:[#allocation6 + $0x18] sm:$0xff] %vm1079_vm10, %v1038_v23  ;;  %v1110_v23 = vld [vmem:[#allocation2 + $0xd9] sm:$0xff] }
  0xb0   : > { %1082 = vst.msk [vmem:[#allocation6 + $0x10] sm:$0xff] %vm1079_vm10, %v1036_v24  ;;  %952 = vrot.lane.b32.xlu1 %v1200_v3, %s3367_s14 }
  0xb1   : > { %950 = vrot.lane.b32.xlu0 %v1199_v4, %s3367_s14 }
  0xb2   : > { %v1131_v27 = vpop.permute.xlu1 %1130 }
  0xb3   : > { %v1129_v28 = vpop.permute.xlu0 %1128  ;;  %1178 = vst.msk [vmem:[#allocation6 + $0x8] sm:$0xff] %vm1176_vm11, %v1131_v27 }
  0xb4   : > { %1177 = vst.msk [vmem:[#allocation6] sm:$0xff] %vm1176_vm11, %v1129_v28  ;;  %956 = vrot.lane.b32.xlu1 %v3718_v25, %s3367_s14 }
  0xb5   : > { %954 = vrot.lane.b32.xlu0 %v3720_v26, %s3367_s14 }
  0xb6   : > { %v1135_v29 = vpop.permute.xlu1 %1134 }
  0xb7   : > { %v1133_v30 = vpop.permute.xlu0 %1132  ;;  %1180 = vst.msk [vmem:[#allocation6 + $0x18] sm:$0xff] %vm1176_vm11, %v1135_v29 }
  0xb8   : > { %1179 = vst.msk [vmem:[#allocation6 + $0x10] sm:$0xff] %vm1176_vm11, %v1133_v30  ;;  %1049 = vrot.lane.b32.xlu1 %v3549_v32, %s3368_s15  ;;  %v3746_v32 = vld [vmem:[#allocation2 + $0xb1] sm:$0xff] }
  0xb9   : > { %1047 = vrot.lane.b32.xlu0 %v3551_v33, %s3368_s15  ;;  %v3748_v33 = vld [vmem:[#allocation2 + $0xa9] sm:$0xff] }
  0xba   : > { %v1228_v31 = vpop.permute.xlu1 %1227 }
  0xbb   : > { %v1226_v34 = vpop.permute.xlu0 %1225  ;;  %1275 = vst.msk [vmem:[#allocation6 + $0x8] sm:$0xff] %vm1273_vm12, %v1228_v31  ;;  %v1208_v31 = vld [vmem:[#allocation2 + $0xe2] sm:$0xff] }
  0xbc   : > { %1274 = vst.msk [vmem:[#allocation6] sm:$0xff] %vm1273_vm12, %v1226_v34  ;;  %1053 = vrot.lane.b32.xlu1 %v3581_v41, %s3368_s15  ;;  %v1207_v34 = vld [vmem:[#allocation2 + $0xda] sm:$0xff] }
  0xbd   : > { %1051 = vrot.lane.b32.xlu0 %v3575_v40, %s3368_s15 }
  0xbe   : > { %v556_v35 = vpop.permute.xlu1 %555 }
  0xbf   : > { %v554_v36 = vpop.permute.xlu0 %553  ;;  %599 = vst.msk [vmem:[#allocation6 + $0x28] sm:$0xff] %vm593_vm5, %v556_v35 }
  0xc0   : > { %598 = vst.msk [vmem:[#allocation6 + $0x20] sm:$0xff] %vm593_vm5, %v554_v36  ;;  %1146 = vrot.lane.b32.xlu1 %v3704_v19, %s3369_s18 }
  0xc1   : > { %1144 = vrot.lane.b32.xlu0 %v3706_v20, %s3369_s18 }
  0xc2   : > { %v1232_v37 = vpop.permute.xlu1 %1231  ;;  %v1291_v42 = vld [vmem:[#allocation6 + $0x8] sm:$0xff] }
  0xc3   : > { %v1230_v38 = vpop.permute.xlu0 %1229  ;;  %v1290_v39 = vld [vmem:[#allocation6] sm:$0xff]  ;;  %1277 = vst.msk [vmem:[#allocation6 + $0x18] sm:$0xff] %vm1273_vm12, %v1232_v37 }
  0xc4   : > { %1276 = vst.msk [vmem:[#allocation6 + $0x10] sm:$0xff] %vm1273_vm12, %v1230_v38  ;;  %v1306_v43 = vpack.c.bf16 %v1291_v42, %v1290_v39  ;;  %1150 = vrot.lane.b32.xlu1 %v3746_v32, %s3369_s18 }
  0xc5   : > { %1148 = vrot.lane.b32.xlu0 %v3748_v33, %s3369_s18 }
  0xc6   : > { %3229 = vmatprep.mubr.msk.bf16.mxu0 %vm1335_vm13, %v1306_v43  ;;  %v560_v44 = vpop.permute.xlu1 %559 }
  0xc7   : > { %v558_v45 = vpop.permute.xlu0 %557  ;;  %601 = vst.msk [vmem:[#allocation6 + $0x38] sm:$0xff] %vm593_vm5, %v560_v44 }
  0xc8   : > { %600 = vst.msk [vmem:[#allocation6 + $0x30] sm:$0xff] %vm593_vm5, %v558_v45  ;;  %1243 = vrot.lane.b32.xlu1 %v3718_v25, %s3370_s9 }
  0xc9   : > { %1241 = vrot.lane.b32.xlu0 %v3720_v26, %s3370_s9 }
  0xca   : > { %v653_v46 = vpop.permute.xlu1 %652  ;;  %v1293_v49 = vld [vmem:[#allocation6 + $0x18] sm:$0xff] }
  0xcb   : > { %v651_v47 = vpop.permute.xlu0 %650  ;;  %v1292_v48 = vld [vmem:[#allocation6 + $0x10] sm:$0xff]  ;;  %696 = vst.msk [vmem:[#allocation6 + $0x28] sm:$0xff] %vm690_vm6, %v653_v46 }
  0xcc   : > { %695 = vst.msk [vmem:[#allocation6 + $0x20] sm:$0xff] %vm690_vm6, %v651_v47  ;;  %v1307_v50 = vpack.c.bf16 %v1293_v49, %v1292_v48  ;;  %571 = vrot.lane.b32.xlu1 %v3704_v19, %s3363_s28 }
  0xcd   : > { %569 = vrot.lane.b32.xlu0 %v3706_v20, %s3363_s28 }
  0xce   : > { %3230 = vmatmul.mubr.msk.bf16.vlgmr.msra.gmra.mrb[0].mxu0 %vm1335_vm13, %v1307_v50  ;;  %v657_v53 = vpop.permute.xlu1 %656 }
  0xcf   : > { %v655_v54 = vpop.permute.xlu0 %654  ;;  %698 = vst.msk [vmem:[#allocation6 + $0x38] sm:$0xff] %vm690_vm6, %v657_v53 }
  0xd0   : > { %697 = vst.msk [vmem:[#allocation6 + $0x30] sm:$0xff] %vm690_vm6, %v655_v54  ;;  %1247 = vrot.lane.b32.xlu1 %v1204_v51, %s3370_s9 }
  0xd1   : > { %1245 = vrot.lane.b32.xlu0 %v1203_v52, %s3370_s9 }
  0xd2   : > { %v751_v55 = vpop.permute.xlu1 %750 }
  0xd3   : > { %v749_v56 = vpop.permute.xlu0 %748  ;;  %794 = vst.msk [vmem:[#allocation6 + $0x28] sm:$0xff] %vm788_vm7, %v751_v55 }
  0xd4   : > { %793 = vst.msk [vmem:[#allocation6 + $0x20] sm:$0xff] %vm788_vm7, %v749_v56  ;;  %575 = vrot.lane.b32.xlu1 %v3746_v32, %s3363_s28 }
  0xd5   : > { %573 = vrot.lane.b32.xlu0 %v3748_v33, %s3363_s28 }
  0xd6   : > { %v755_v57 = vpop.permute.xlu1 %754 }
  0xd7   : > { %v753_v58 = vpop.permute.xlu0 %752  ;;  %796 = vst.msk [vmem:[#allocation6 + $0x38] sm:$0xff] %vm788_vm7, %v755_v57 }
  0xd8   : > { %795 = vst.msk [vmem:[#allocation6 + $0x30] sm:$0xff] %vm788_vm7, %v753_v58  ;;  %668 = vrot.lane.b32.xlu1 %v3718_v25, %s3364_s29 }
  0xd9   : > { %666 = vrot.lane.b32.xlu0 %v3720_v26, %s3364_s29 }
  0xda   : > { %v848_v59 = vpop.permute.xlu1 %847 }
  0xdb   : > { %v846_v60 = vpop.permute.xlu0 %845  ;;  %891 = vst.msk [vmem:[#allocation6 + $0x28] sm:$0xff] %vm885_vm8, %v848_v59 }
  0xdc   : > { %890 = vst.msk [vmem:[#allocation6 + $0x20] sm:$0xff] %vm885_vm8, %v846_v60  ;;  %672 = vrot.lane.b32.xlu1 %v1204_v51, %s3364_s29 }
  0xdd   : > { %670 = vrot.lane.b32.xlu0 %v1203_v52, %s3364_s29 }
  0xde   : > { %v852_v61 = vpop.permute.xlu1 %851 }
  0xdf   : > { %v850_v62 = vpop.permute.xlu0 %849  ;;  %893 = vst.msk [vmem:[#allocation6 + $0x38] sm:$0xff] %vm885_vm8, %v852_v61 }
  0xe0   : > { %892 = vst.msk [vmem:[#allocation6 + $0x30] sm:$0xff] %vm885_vm8, %v850_v62  ;;  %766 = vrot.lane.b32.xlu1 %v3581_v41, %s3365_s30  ;;  %v819_v41 = vld [vmem:[#allocation2 + $0xc1] sm:$0xff] }
  0xe1   : > { %764 = vrot.lane.b32.xlu0 %v3575_v40, %s3365_s30  ;;  %v820_v40 = vld [vmem:[#allocation2 + $0xc9] sm:$0xff] }
  0xe2   : > { %v945_v2 = vpop.permute.xlu1 %944 }
  0xe3   : > { %v943_v3 = vpop.permute.xlu0 %942  ;;  %988 = vst.msk [vmem:[#allocation6 + $0x28] sm:$0xff] %vm982_vm9, %v945_v2 }
  0xe4   : > { %987 = vst.msk [vmem:[#allocation6 + $0x20] sm:$0xff] %vm982_vm9, %v943_v3  ;;  %770 = vrot.lane.b32.xlu1 %v723_v63, %s3365_s30  ;;  %v3306_v3 = vld [vmem:[#allocation3 + $0x1] ss:$8 sps:$4 sm:$0xff]  }
  0xe5   : > { %768 = vrot.lane.b32.xlu0 %v722_v0, %s3365_s30  ;;  %s3371_s30 = smov 40  }
  0xe6   : > { %v949_v4 = vpop.permute.xlu1 %948 }
  0xe7   : > { %v947_v5 = vpop.permute.xlu0 %946  ;;  %990 = vst.msk [vmem:[#allocation6 + $0x38] sm:$0xff] %vm982_vm9, %v949_v4  ;;  %v3307_v4 = vld [vmem:[#allocation3 + $0x2] ss:$8 sps:$4 sm:$0xff]  }
  0xe8   : > { %989 = vst.msk [vmem:[#allocation6 + $0x30] sm:$0xff] %vm982_vm9, %v947_v5  ;;  %863 = vrot.lane.b32.xlu1 %v3746_v32, %s3366_s13 }
  0xe9   : > { %861 = vrot.lane.b32.xlu0 %v3748_v33, %s3366_s13 }
  0xea   : > { %v1042_v6 = vpop.permute.xlu1 %1041 }
  0xeb   : > { %v1040_v7 = vpop.permute.xlu0 %1039  ;;  %1085 = vst.msk [vmem:[#allocation6 + $0x28] sm:$0xff] %vm1079_vm10, %v1042_v6 }
  0xec   : > { %1084 = vst.msk [vmem:[#allocation6 + $0x20] sm:$0xff] %vm1079_vm10, %v1040_v7  ;;  %867 = vrot.lane.b32.xlu1 %v820_v40, %s3366_s13 }
  0xed   : > { %865 = vrot.lane.b32.xlu0 %v819_v41, %s3366_s13 }
  0xee   : > { %v1046_v8 = vpop.permute.xlu1 %1045 }
  0xef   : > { %v1044_v9 = vpop.permute.xlu0 %1043  ;;  %1087 = vst.msk [vmem:[#allocation6 + $0x38] sm:$0xff] %vm1079_vm10, %v1046_v8 }
  0xf0   : > { %1086 = vst.msk [vmem:[#allocation6 + $0x30] sm:$0xff] %vm1079_vm10, %v1044_v9  ;;  %960 = vrot.lane.b32.xlu1 %v1204_v51, %s3367_s14 }
  0xf1   : > { %958 = vrot.lane.b32.xlu0 %v1203_v52, %s3367_s14 }
  0xf2   : > { %v1139_v12 = vpop.permute.xlu1 %1138 }
  0xf3   : > { %v1137_v13 = vpop.permute.xlu0 %1136  ;;  %1182 = vst.msk [vmem:[#allocation6 + $0x28] sm:$0xff] %vm1176_vm11, %v1139_v12 }
  0xf4   : > { %1181 = vst.msk [vmem:[#allocation6 + $0x20] sm:$0xff] %vm1176_vm11, %v1137_v13  ;;  %964 = vrot.lane.b32.xlu1 %v917_v10, %s3367_s14 }
  0xf5   : > { %962 = vrot.lane.b32.xlu0 %v916_v11, %s3367_s14  ;;  %s3372_s14 = smov 48  }
  0xf6   : > { %v1143_v14 = vpop.permute.xlu1 %1142 }
  0xf7   : > { %v1141_v15 = vpop.permute.xlu0 %1140  ;;  %1184 = vst.msk [vmem:[#allocation6 + $0x38] sm:$0xff] %vm1176_vm11, %v1143_v14 }
  0xf8   : > { %1183 = vst.msk [vmem:[#allocation6 + $0x30] sm:$0xff] %vm1176_vm11, %v1141_v15  ;;  %1057 = vrot.lane.b32.xlu1 %v723_v63, %s3368_s15 }
  0xf9   : > { %1055 = vrot.lane.b32.xlu0 %v722_v0, %s3368_s15 }
  0xfa   : > { %v1236_v18 = vpop.permute.xlu1 %1235 }
  0xfb   : > { %v1234_v19 = vpop.permute.xlu0 %1233  ;;  %1279 = vst.msk [vmem:[#allocation6 + $0x28] sm:$0xff] %vm1273_vm12, %v1236_v18 }
  0xfc   : > { %1278 = vst.msk [vmem:[#allocation6 + $0x20] sm:$0xff] %vm1273_vm12, %v1234_v19  ;;  %1061 = vrot.lane.b32.xlu1 %v1014_v16, %s3368_s15 }
  0xfd   : > { %1059 = vrot.lane.b32.xlu0 %v1013_v17, %s3368_s15 }
  0xfe   : > { %v564_v20 = vpop.permute.xlu1 %563 }
  0xff   : > { %v562_v21 = vpop.permute.xlu0 %561  ;;  %603 = vst.msk [vmem:[#allocation6 + $0x48] sm:$0xff] %vm593_vm5, %v564_v20 }
 0x100   : > { %602 = vst.msk [vmem:[#allocation6 + $0x40] sm:$0xff] %vm593_vm5, %v562_v21  ;;  %1154 = vrot.lane.b32.xlu1 %v820_v40, %s3369_s18 }
 0x101   : > { %1152 = vrot.lane.b32.xlu0 %v819_v41, %s3369_s18 }
 0x102   : > { %v1240_v24 = vpop.permute.xlu1 %1239  ;;  %v1295_v27 = vld [vmem:[#allocation6 + $0x28] sm:$0xff] }
 0x103   : > { %v1238_v25 = vpop.permute.xlu0 %1237  ;;  %v1294_v26 = vld [vmem:[#allocation6 + $0x20] sm:$0xff]  ;;  %1281 = vst.msk [vmem:[#allocation6 + $0x38] sm:$0xff] %vm1273_vm12, %v1240_v24 }
 0x104   : > { %1280 = vst.msk [vmem:[#allocation6 + $0x30] sm:$0xff] %vm1273_vm12, %v1238_v25  ;;  %v1308_v28 = vpack.c.bf16 %v1295_v27, %v1294_v26  ;;  %1158 = vrot.lane.b32.xlu1 %v1111_v22, %s3369_s18 }
 0x105   : > { %1156 = vrot.lane.b32.xlu0 %v1110_v23, %s3369_s18 }
 0x106   : > { %3233 = vmatprep.mubr.msk.bf16.mxu0 %vm1335_vm13, %v1308_v28  ;;  %v568_v29 = vpop.permute.xlu1 %567 }
 0x107   : > { %v566_v30 = vpop.permute.xlu0 %565  ;;  %605 = vst.msk [vmem:[#allocation6 + $0x58] sm:$0xff] %vm593_vm5, %v568_v29 }
 0x108   : > { %604 = vst.msk [vmem:[#allocation6 + $0x50] sm:$0xff] %vm593_vm5, %v566_v30  ;;  %1251 = vrot.lane.b32.xlu1 %v917_v10, %s3370_s9 }
 0x109   : > { %1249 = vrot.lane.b32.xlu0 %v916_v11, %s3370_s9 }
 0x10a   : > { %v661_v35 = vpop.permute.xlu1 %660  ;;  %v1297_v33 = vld [vmem:[#allocation6 + $0x38] sm:$0xff] }
 0x10b   : > { %v659_v36 = vpop.permute.xlu0 %658  ;;  %v1296_v32 = vld [vmem:[#allocation6 + $0x30] sm:$0xff]  ;;  %700 = vst.msk [vmem:[#allocation6 + $0x48] sm:$0xff] %vm690_vm6, %v661_v35 }
 0x10c   : > { %699 = vst.msk [vmem:[#allocation6 + $0x40] sm:$0xff] %vm690_vm6, %v659_v36  ;;  %v1309_v37 = vpack.c.bf16 %v1297_v33, %v1296_v32  ;;  %1255 = vrot.lane.b32.xlu1 %v1208_v31, %s3370_s9 }
 0x10d   : > { %1253 = vrot.lane.b32.xlu0 %v1207_v34, %s3370_s9 }
 0x10e   : > { %3234 = vmatmul.mubr.msk.bf16.gmra.mrb[4].mxu0 %vm1335_vm13, %v1309_v37  ;;  %v665_v38 = vpop.permute.xlu1 %664 }
 0x10f   : > { %v663_v39 = vpop.permute.xlu0 %662  ;;  %702 = vst.msk [vmem:[#allocation6 + $0x58] sm:$0xff] %vm690_vm6, %v665_v38 }
 0x110   : > { %701 = vst.msk [vmem:[#allocation6 + $0x50] sm:$0xff] %vm690_vm6, %v663_v39 }
 0x111   : > { %2232 = vrot.lane.b32.xlu0 %v3306_v3, %s3364_s29 }
 0x112   : > { %v759_v42 = vpop.permute.xlu1 %758 }
 0x113   : > { %v757_v43 = vpop.permute.xlu0 %756  ;;  %798 = vst.msk [vmem:[#allocation6 + $0x48] sm:$0xff] %vm788_vm7, %v759_v42 }
 0x114   : > { %797 = vst.msk [vmem:[#allocation6 + $0x40] sm:$0xff] %vm788_vm7, %v757_v43 }
 0x115   : > { %2269 = vrot.lane.b32.xlu0 %v3307_v4, %s3366_s13 }
 0x116   : > { %v763_v44 = vpop.permute.xlu1 %762 }
 0x117   : > { %v761_v45 = vpop.permute.xlu0 %760  ;;  %800 = vst.msk [vmem:[#allocation6 + $0x58] sm:$0xff] %vm788_vm7, %v763_v44 }
 0x118   : > { %799 = vst.msk [vmem:[#allocation6 + $0x50] sm:$0xff] %vm788_vm7, %v761_v45 }
 0x11a   : > { %v856_v46 = vpop.permute.xlu1 %855 }
 0x11b   : > { %v854_v47 = vpop.permute.xlu0 %853  ;;  %895 = vst.msk [vmem:[#allocation6 + $0x48] sm:$0xff] %vm885_vm8, %v856_v46 }
 0x11c   : > { %894 = vst.msk [vmem:[#allocation6 + $0x40] sm:$0xff] %vm885_vm8, %v854_v47 }
 0x11e   : > { %v860_v48 = vpop.permute.xlu1 %859 }
 0x11f   : > { %v858_v49 = vpop.permute.xlu0 %857  ;;  %897 = vst.msk [vmem:[#allocation6 + $0x58] sm:$0xff] %vm885_vm8, %v860_v48 }
 0x120   : > { %896 = vst.msk [vmem:[#allocation6 + $0x50] sm:$0xff] %vm885_vm8, %v858_v49  ;;  %v3915_v49 = vld [vmem:[%s4192_s2] ss:$0 sm:$0xff] }
 0x122   : > { %v953_v50 = vpop.permute.xlu1 %952 }
 0x123   : > { %v951_v51 = vpop.permute.xlu0 %950  ;;  %992 = vst.msk [vmem:[#allocation6 + $0x48] sm:$0xff] %vm982_vm9, %v953_v50  ;;  %v1993_v50 = vlaneseq }
 0x124   : > { %991 = vst.msk [vmem:[#allocation6 + $0x40] sm:$0xff] %vm982_vm9, %v951_v51  ;;  %v3920_v51 = vld [vmem:[%s4193_s3] ss:$0 sm:$0xff] }
 0x126   : > { %v957_v52 = vpop.permute.xlu1 %956 }
 0x127   : > { %v955_v53 = vpop.permute.xlu0 %954  ;;  %994 = vst.msk [vmem:[#allocation6 + $0x58] sm:$0xff] %vm982_vm9, %v957_v52 }
 0x128   : > { %993 = vst.msk [vmem:[#allocation6 + $0x50] sm:$0xff] %vm982_vm9, %v955_v53 }
 0x12a   : > { %v1050_v54 = vpop.permute.xlu1 %1049 }
 0x12b   : > { %v1048_v55 = vpop.permute.xlu0 %1047  ;;  %1089 = vst.msk [vmem:[#allocation6 + $0x48] sm:$0xff] %vm1079_vm10, %v1050_v54 }
 0x12c   : > { %1088 = vst.msk [vmem:[#allocation6 + $0x40] sm:$0xff] %vm1079_vm10, %v1048_v55  ;;  %v1994_v55 = vshrl.u32 %v1993_v50, 7 }
 0x12e   : > { %v1054_v56 = vpop.permute.xlu1 %1053  ;;  %v3929_v4 = vsub.s32 0, %v1994_v55 }
 0x12f   : > { %v1052_v57 = vpop.permute.xlu0 %1051  ;;  %1091 = vst.msk [vmem:[#allocation6 + $0x58] sm:$0xff] %vm1079_vm10, %v1054_v56 }
 0x130   : > { %1090 = vst.msk [vmem:[#allocation6 + $0x50] sm:$0xff] %vm1079_vm10, %v1052_v57 }
 0x132   : > { %v1147_v58 = vpop.permute.xlu1 %1146 }
 0x133   : > { %v1145_v59 = vpop.permute.xlu0 %1144  ;;  %1186 = vst.msk [vmem:[#allocation6 + $0x48] sm:$0xff] %vm1176_vm11, %v1147_v58 }
 0x134   : > { %1185 = vst.msk [vmem:[#allocation6 + $0x40] sm:$0xff] %vm1176_vm11, %v1145_v59 }
 0x136   : > { %v1151_v60 = vpop.permute.xlu1 %1150 }
 0x137   : > { %v1149_v61 = vpop.permute.xlu0 %1148  ;;  %1188 = vst.msk [vmem:[#allocation6 + $0x58] sm:$0xff] %vm1176_vm11, %v1151_v60 }
 0x138   : > { %1187 = vst.msk [vmem:[#allocation6 + $0x50] sm:$0xff] %vm1176_vm11, %v1149_v61 }
 0x13a   : > { %v1244_v62 = vpop.permute.xlu1 %1243 }
 0x13b   : > { %v1242_v63 = vpop.permute.xlu0 %1241  ;;  %1283 = vst.msk [vmem:[#allocation6 + $0x48] sm:$0xff] %vm1273_vm12, %v1244_v62 }
 0x13c   : > { %1282 = vst.msk [vmem:[#allocation6 + $0x40] sm:$0xff] %vm1273_vm12, %v1242_v63 }
 0x13e   : > { %v572_v0 = vpop.permute.xlu1 %571 }
 0x13f   : > { %v570_v2 = vpop.permute.xlu0 %569  ;;  %607 = vst.msk [vmem:[#allocation6 + $0x68] sm:$0xff] %vm593_vm5, %v572_v0 }
 0x140   : > { %606 = vst.msk [vmem:[#allocation6 + $0x60] sm:$0xff] %vm593_vm5, %v570_v2 }
 0x142   : > { %v1248_v5 = vpop.permute.xlu1 %1247  ;;  %v1299_v6 = vld [vmem:[#allocation6 + $0x48] sm:$0xff] }
 0x143   : > { %v1246_v40 = vpop.permute.xlu0 %1245  ;;  %v1298_v41 = vld [vmem:[#allocation6 + $0x40] sm:$0xff]  ;;  %1285 = vst.msk [vmem:[#allocation6 + $0x58] sm:$0xff] %vm1273_vm12, %v1248_v5 }
 0x144   : > { %1284 = vst.msk [vmem:[#allocation6 + $0x50] sm:$0xff] %vm1273_vm12, %v1246_v40  ;;  %v1310_v7 = vpack.c.bf16 %v1299_v6, %v1298_v41 }
 0x146   : > { %3237 = vmatprep.mubr.msk.bf16.mxu0 %vm1335_vm13, %v1310_v7  ;;  %v576_v8 = vpop.permute.xlu1 %575 }
 0x147   : > { %v574_v9 = vpop.permute.xlu0 %573  ;;  %609 = vst.msk [vmem:[#allocation6 + $0x78] sm:$0xff] %vm593_vm5, %v576_v8 }
 0x148   : > { %608 = vst.msk [vmem:[#allocation6 + $0x70] sm:$0xff] %vm593_vm5, %v574_v9 }
 0x14a   : > { %v669_v10 = vpop.permute.xlu1 %668  ;;  %v1301_v13 = vld [vmem:[#allocation6 + $0x58] sm:$0xff] }
 0x14b   : > { %v667_v11 = vpop.permute.xlu0 %666  ;;  %v1300_v12 = vld [vmem:[#allocation6 + $0x50] sm:$0xff]  ;;  %704 = vst.msk [vmem:[#allocation6 + $0x68] sm:$0xff] %vm690_vm6, %v669_v10 }
 0x14c   : > { %703 = vst.msk [vmem:[#allocation6 + $0x60] sm:$0xff] %vm690_vm6, %v667_v11  ;;  %v1311_v14 = vpack.c.bf16 %v1301_v13, %v1300_v12 }
 0x14e   : > { %3238 = vmatmul.mubr.msk.bf16.gmra.mrb[8].mxu0 %vm1335_vm13, %v1311_v14  ;;  %v673_v15 = vpop.permute.xlu1 %672 }
 0x14f   : > { %v671_v16 = vpop.permute.xlu0 %670  ;;  %706 = vst.msk [vmem:[#allocation6 + $0x78] sm:$0xff] %vm690_vm6, %v673_v15 }
 0x150   : > { %705 = vst.msk [vmem:[#allocation6 + $0x70] sm:$0xff] %vm690_vm6, %v671_v16  ;;  %vm2123_vm6 = vcmask 1042434  }
 0x152   : > { %v767_v17 = vpop.permute.xlu1 %766 }
 0x153   : > { %v765_v18 = vpop.permute.xlu0 %764  ;;  %802 = vst.msk [vmem:[#allocation6 + $0x68] sm:$0xff] %vm788_vm7, %v767_v17 }
 0x154   : > { %801 = vst.msk [vmem:[#allocation6 + $0x60] sm:$0xff] %vm788_vm7, %v765_v18 }
 0x156   : > { %v771_v19 = vpop.permute.xlu1 %770 }
 0x157   : > { %v769_v20 = vpop.permute.xlu0 %768  ;;  %804 = vst.msk [vmem:[#allocation6 + $0x78] sm:$0xff] %vm788_vm7, %v771_v19 }
 0x158   : > { %803 = vst.msk [vmem:[#allocation6 + $0x70] sm:$0xff] %vm788_vm7, %v769_v20  ;;  %vm2125_vm7 = vcmask 1043459  }
 0x15a   : > { %v864_v21 = vpop.permute.xlu1 %863 }
 0x15b   : > { %v862_v22 = vpop.permute.xlu0 %861  ;;  %899 = vst.msk [vmem:[#allocation6 + $0x68] sm:$0xff] %vm885_vm8, %v864_v21 }
 0x15c   : > { %898 = vst.msk [vmem:[#allocation6 + $0x60] sm:$0xff] %vm885_vm8, %v862_v22 }
 0x15e   : > { %v868_v23 = vpop.permute.xlu1 %867 }
 0x15f   : > { %v866_v24 = vpop.permute.xlu0 %865  ;;  %901 = vst.msk [vmem:[#allocation6 + $0x78] sm:$0xff] %vm885_vm8, %v868_v23 }
 0x160   : > { %900 = vst.msk [vmem:[#allocation6 + $0x70] sm:$0xff] %vm885_vm8, %v866_v24  ;;  %vm4203_vm8 = vcmask 64512  }
 0x162   : > { %v961_v25 = vpop.permute.xlu1 %960 }
 0x163   : > { %v959_v26 = vpop.permute.xlu0 %958  ;;  %996 = vst.msk [vmem:[#allocation6 + $0x68] sm:$0xff] %vm982_vm9, %v961_v25 }
 0x164   : > { %995 = vst.msk [vmem:[#allocation6 + $0x60] sm:$0xff] %vm982_vm9, %v959_v26 }
 0x166   : > { %v965_v27 = vpop.permute.xlu1 %964 }
 0x167   : > { %v963_v28 = vpop.permute.xlu0 %962  ;;  %998 = vst.msk [vmem:[#allocation6 + $0x78] sm:$0xff] %vm982_vm9, %v965_v27 }
 0x168   : > { %997 = vst.msk [vmem:[#allocation6 + $0x70] sm:$0xff] %vm982_vm9, %v963_v28  ;;  %vm2244_vm9 = vcmask 130112  }
 0x16a   : > { %v1058_v29 = vpop.permute.xlu1 %1057 }
 0x16b   : > { %v1056_v30 = vpop.permute.xlu0 %1055  ;;  %1093 = vst.msk [vmem:[#allocation6 + $0x68] sm:$0xff] %vm1079_vm10, %v1058_v29 }
 0x16c   : > { %1092 = vst.msk [vmem:[#allocation6 + $0x60] sm:$0xff] %vm1079_vm10, %v1056_v30 }
 0x16e   : > { %v1062_v31 = vpop.permute.xlu1 %1061 }
 0x16f   : > { %v1060_v34 = vpop.permute.xlu0 %1059  ;;  %1095 = vst.msk [vmem:[#allocation6 + $0x78] sm:$0xff] %vm1079_vm10, %v1062_v31 }
 0x170   : > { %1094 = vst.msk [vmem:[#allocation6 + $0x70] sm:$0xff] %vm1079_vm10, %v1060_v34  ;;  %vm2281_vm10 = vcmask 195712  }
 0x172   : > { %v1155_v35 = vpop.permute.xlu1 %1154 }
 0x173   : > { %v1153_v36 = vpop.permute.xlu0 %1152  ;;  %1190 = vst.msk [vmem:[#allocation6 + $0x68] sm:$0xff] %vm1176_vm11, %v1155_v35 }
 0x174   : > { %1189 = vst.msk [vmem:[#allocation6 + $0x60] sm:$0xff] %vm1176_vm11, %v1153_v36 }
 0x176   : > { %v1159_v32 = vpop.permute.xlu1 %1158 }
 0x177   : > { %v1157_v33 = vpop.permute.xlu0 %1156  ;;  %1192 = vst.msk [vmem:[#allocation6 + $0x78] sm:$0xff] %vm1176_vm11, %v1159_v32 }
 0x178   : > { %1191 = vst.msk [vmem:[#allocation6 + $0x70] sm:$0xff] %vm1176_vm11, %v1157_v33 }
 0x17a   : > { %v1252_v37 = vpop.permute.xlu1 %1251 }
 0x17b   : > { %v1250_v38 = vpop.permute.xlu0 %1249  ;;  %1287 = vst.msk [vmem:[#allocation6 + $0x68] sm:$0xff] %vm1273_vm12, %v1252_v37 }
 0x17c   : > { %1286 = vst.msk [vmem:[#allocation6 + $0x60] sm:$0xff] %vm1273_vm12, %v1250_v38 }
 0x17e   : > { %v1256_v39 = vpop.permute.xlu1 %1255 }
 0x17f   : > { %v1254_v42 = vpop.permute.xlu0 %1253  ;;  %1289 = vst.msk [vmem:[#allocation6 + $0x78] sm:$0xff] %vm1273_vm12, %v1256_v39 }
 0x180   : > { %1288 = vst.msk [vmem:[#allocation6 + $0x70] sm:$0xff] %vm1273_vm12, %v1254_v42 }
 0x182   : > { %v1303_v44 = vld [vmem:[#allocation6 + $0x68] sm:$0xff] }
 0x183   : > { %v1302_v43 = vld [vmem:[#allocation6 + $0x60] sm:$0xff] }
 0x184   : > { %v1312_v45 = vpack.c.bf16 %v1303_v44, %v1302_v43 }
 0x186   : > { %3241 = vmatprep.mubr.msk.bf16.mxu0 %vm1335_vm13, %v1312_v45  ;;  %v1305_v47 = vld [vmem:[#allocation6 + $0x78] sm:$0xff] }
 0x187   : > { %v1304_v46 = vld [vmem:[#allocation6 + $0x70] sm:$0xff] }
 0x188   : > { %v1313_v48 = vpack.c.bf16 %v1305_v47, %v1304_v46 }
 0x18a   : > { %3242 = vmatmul.mubr.msk.bf16.gmra.mrb[12].mxu0 %vm1335_vm13, %v1313_v48 }
 0x1a1   : > { %v3231_v52 = vpop.f32.mrb[0].mxu0 }
 0x1a2   : > { %v1407_v53 = vadd.f32 %v3231_v52, %v3915_v49  ;;  %v1398_v54 = vpop.f32.mrb[1].mxu0 }
 0x1a3   : > { %v1399_v56 = vadd.f32 %v3915_v49, %v1398_v54  ;;  %v3232_v57 = vpop.f32.mrb[2].mxu0 }
 0x1a4   : > { %vm1463_vm0 = vcmp.ge.f32.partialorder %v1407_v53, 0.0  ;;  %v1485_v58 = vmul.f32 %v3920_v51, %v1407_v53  ;;  %v1410_v59 = vadd.f32 %v3232_v57, %v3915_v49  ;;  %v1401_v60 = vpop.f32.mrb[3].mxu0 }
 0x1a5   : > { %vm1461_vm1 = vcmp.ge.f32.partialorder %v1399_v56, 0.0  ;;  %v1483_v61 = vmul.f32 %v3920_v51, %v1399_v56  ;;  %v1402_v62 = vadd.f32 %v3915_v49, %v1401_v60 }
 0x1a6   : > { %v1501_v63 = vsel %vm1463_vm0, %v1407_v53, %v1485_v58  ;;  %vm1464_vm2 = vcmp.ge.f32.partialorder %v1410_v59, 0.0  ;;  %v1486_v0 = vmul.f32 %v3920_v51, %v1410_v59 }
 0x1a7   : > { %v1533_v2 = vcombine.high %v1501_v63, %v1501_v63  ;;  %v3060_v3 = vrot.slane %v1501_v63, 9  ;;  %v3092_v5 = vrot.slane %v1501_v63, 10  ;;  %v1499_v40 = vsel %vm1461_vm1, %v1399_v56, %v1483_v61 }
 0x1a8   : > { %v1502_v41 = vsel %vm1464_vm2, %v1410_v59, %v1486_v0  ;;  %v3124_v8 = vrot.slane %v1501_v63, 11  ;;  %vm1462_vm5 = vcmp.ge.f32.partialorder %v1402_v62, 0.0  ;;  %v1531_v10 = vcombine.high %v1499_v40, %v1499_v40 }
 0x1a9   : > { %v3061_v6 = vrot.slane %v1533_v2, 9  ;;  %v1663_v7 = vmax.f32 %v1501_v63, %v3060_v3  ;;  %v3093_v9 = vrot.slane %v1533_v2, 10  ;;  %v3056_v11 = vrot.slane %v1499_v40, 9 }
 0x1aa   : > { %v1484_v12 = vmul.f32 %v3920_v51, %v1402_v62  ;;  %v1534_v15 = vcombine.high %v1502_v41, %v1502_v41  ;;  %v3062_v16 = vrot.slane %v1502_v41, 9  ;;  %v3125_v17 = vrot.slane %v1533_v2, 11 }
 0x1ab   : > { %v1664_v13 = vmax.f32 %v1533_v2, %v3061_v6  ;;  %v1791_v14 = vmax.f32 %v1663_v7, %v3092_v5  ;;  %v3057_v18 = vrot.slane %v1531_v10, 9  ;;  %v1659_v19 = vmax.f32 %v1499_v40, %v3056_v11 }
 0x1ac   : > { %v3088_v20 = vrot.slane %v1499_v40, 10  ;;  %v3063_v23 = vrot.slane %v1534_v15, 9  ;;  %v1665_v24 = vmax.f32 %v1502_v41, %v3062_v16  ;;  %v3089_v26 = vrot.slane %v1531_v10, 10 }
 0x1ad   : > { %v1792_v21 = vmax.f32 %v1664_v13, %v3093_v9  ;;  %v1919_v22 = vmax.f32 %v1791_v14, %v3124_v8  ;;  %v1660_v25 = vmax.f32 %v1531_v10, %v3057_v18  ;;  %v3121_v27 = vrot.slane %v1531_v10, 11  ;;  %v3324_v9 = vld [vmem:[#allocation3] ss:$8 sps:$4 sm:$0xff]  }
 0x1ae   : > { %v3094_v28 = vrot.slane %v1502_v41, 10  ;;  %v1787_v30 = vmax.f32 %v1659_v19, %v3088_v20  ;;  %v1666_v31 = vmax.f32 %v1534_v15, %v3063_v23  ;;  %v3095_v34 = vrot.slane %v1534_v15, 10  ;;  %2208 = vst.msk [vmem:[#allocation6] sm:$0xff] %vm4203_vm8, %v3324_v9 }
 0x1af   : > { %v1920_v29 = vmax.f32 %v1792_v21, %v3125_v17  ;;  %v2012_v35 = vrot.slane %v1919_v22, %v3929_v4  ;;  %v1788_v36 = vmax.f32 %v1660_v25, %v3089_v26  ;;  %v3126_v33 = vrot.slane %v1502_v41, 11 }
 0x1b0   : > { %v1793_v32 = vmax.f32 %v1665_v24, %v3094_v28  ;;  %v1794_v38 = vmax.f32 %v1666_v31, %v3095_v34  ;;  %v3127_v39 = vrot.slane %v1534_v15, 11  ;;  %v1500_v42 = vsel %vm1462_vm5, %v1402_v62, %v1484_v12 }
 0x1b1   : > { %v2016_v37 = vrot.slane %v1920_v29, %v3929_v4  ;;  %2168 = vst.msk [vmem:[#allocation3 + $0x18] sm:$0x1] %vm2166_vm3, %v1920_v29  ;;  %v3120_v43 = vrot.slane %v1499_v40, 11  ;;  %v1916_v44 = vmax.f32 %v1788_v36, %v3121_v27  ;;  %v1532_v46 = vcombine.high %v1500_v42, %v1500_v42  ;;  %v2233_v40 = vpop.permute.xlu0 %2232 }
 0x1b2   : > { %v1921_v45 = vmax.f32 %v1793_v32, %v3126_v33  ;;  %v1922_v48 = vmax.f32 %v1794_v38, %v3127_v39  ;;  %v3058_v50 = vrot.slane %v1500_v42, 9  ;;  %v3090_v57 = vrot.slane %v1500_v42, 10  ;;  %2245 = vst.msk [vmem:[#allocation6] sm:$0xff] %vm2244_vm9, %v2233_v40 }
 0x1b3   : > { %v2127_v47 = vsel %vm2121_vm4, %v2016_v37, %v2012_v35  ;;  %v1915_v52 = vmax.f32 %v1787_v30, %v3120_v43  ;;  %2167 = vst.msk [vmem:[#allocation3 + $0x10] sm:$0x1] %vm2166_vm3, %v1916_v44  ;;  %v3059_v54 = vrot.slane %v1532_v46, 9  ;;  %v2000_v58 = vrot.slane %v1916_v44, %v3929_v4 }
 0x1b4   : > { %v2020_v53 = vrot.slane %v1921_v45, %v3929_v4  ;;  %2176 = vst.msk [vmem:[#allocation3 + $0x1d] sm:$0x1] %vm2166_vm3, %v1921_v45  ;;  %v2024_v55 = vrot.slane %v1922_v48, %v3929_v4  ;;  %v1661_v56 = vmax.f32 %v1500_v42, %v3058_v50  ;;  %v3091_v61 = vrot.slane %v1532_v46, 10 }
 0x1b5   : > { %v1662_v60 = vmax.f32 %v1532_v46, %v3059_v54  ;;  %v3122_v0 = vrot.slane %v1500_v42, 11  ;;  %v1996_v2 = vrot.slane %v1915_v52, %v3929_v4  ;;  %v3123_v5 = vrot.slane %v1532_v46, 11  ;;  %v2270_v13 = vpop.permute.xlu0 %2269 }
 0x1b6   : > { %v2128_v59 = vsel %vm2123_vm6, %v2020_v53, %v2127_v47  ;;  %v1789_v63 = vmax.f32 %v1661_v56, %v3090_v57  ;;  %2282 = vst.msk [vmem:[#allocation6] sm:$0xff] %vm2281_vm10, %v2270_v13 }
 0x1b7   : > { %v2129_v62 = vsel %vm2125_vm7, %v2024_v55, %v2128_v59  ;;  %v1790_v3 = vmax.f32 %v1662_v60, %v3091_v61  ;;  %v2122_v6 = vsel %vm2121_vm4, %v2000_v58, %v1996_v2 }
 0x1b8   : > { %2159 = vst.msk [vmem:[#allocation3 + $0x19] sm:$0xf] %vm2157_vm14, %v2129_v62  ;;  %v1917_v41 = vmax.f32 %v1789_v63, %v3122_v0 }
 0x1b9   : > { %v1918_v7 = vmax.f32 %v1790_v3, %v3123_v5 }
 0x1ba   : > { %v2004_v8 = vrot.slane %v1917_v41, %v3929_v4  ;;  %2175 = vst.msk [vmem:[#allocation3 + $0x15] sm:$0x1] %vm2166_vm3, %v1917_v41 }
 0x1bb   : > { %v2008_v10 = vrot.slane %v1918_v7, %v3929_v4 }
 0x1bc   : > { %v2124_v11 = vsel %vm2123_vm6, %v2004_v8, %v2122_v6 }
 0x1bd   : > { %v2126_v12 = vsel %vm2125_vm7, %v2008_v10, %v2124_v11 }
 0x1be   : > { %2158 = vst.msk [vmem:[#allocation3 + $0x11] sm:$0xf] %vm2157_vm14, %v2126_v12 }
 0x1c5   : > { %v3308_v14 = vld [vmem:[#allocation3 + $0x11] ss:$8 sps:$4 sm:$0xff]  }
 0x1c6   : > { %v3309_v15 = vld [vmem:[#allocation3 + $0x8] ss:$8 sps:$4 sm:$0xff]   ;;  %2234 = vrot.lane.b32.xlu1 %v3308_v14, %s3364_s29 }
 0x1c7   : > { %2307 = vrot.lane.b32.xlu0 %v3309_v15, %s3368_s15  ;;  %v3310_v16 = vld [vmem:[#allocation3 + $0x12] ss:$8 sps:$4 sm:$0xff]  }
 0x1c8   : > { %v3311_v17 = vld [vmem:[#allocation3 + $0x9] ss:$8 sps:$4 sm:$0xff]  }
 0x1c9   : > { %v3325_v18 = vld [vmem:[#allocation3 + $0x10] ss:$8 sps:$4 sm:$0xff]  }
 0x1ca   : > { %2271 = vrot.lane.b32.xlu1 %v3310_v16, %s3366_s13  ;;  %2209 = vst.msk [vmem:[#allocation6 + $0x8] sm:$0xff] %vm4203_vm8, %v3325_v18  ;;  %v3312_v19 = vld [vmem:[#allocation3 + $0xa] ss:$8 sps:$4 sm:$0xff]  }
 0x1cb   : > { %2344 = vrot.lane.b32.xlu0 %v3311_v17, %s3370_s9  ;;  %v3313_v20 = vld [vmem:[#allocation3 + $0x10] ss:$8 sps:$4 sm:$0xff]  }
 0x1cc   : > { %v3314_v21 = vld [vmem:[#allocation3 + $0x11] ss:$8 sps:$4 sm:$0xff]  }
 0x1cd   : > { %v3315_v22 = vld [vmem:[#allocation3 + $0x12] ss:$8 sps:$4 sm:$0xff]  }
 0x1cf   : > { %2381 = vrot.lane.b32.xlu0 %v3312_v19, %s3371_s30 }
 0x1d3   : > { %2418 = vrot.lane.b32.xlu0 %v3313_v20, %s3372_s14 }
 0x1d7   : > { %2455 = vrot.lane.b32.xlu0 %v3314_v21, %s3373_s16 }
 0x1db   : > { %2492 = vrot.lane.b32.xlu0 %v3315_v22, %s3374_s17 }
 0x1e1   : > { %v3235_v23 = vpop.f32.mrb[4].mxu0 }
 0x1e2   : > { %v1423_v24 = vadd.f32 %v3235_v23, %v3915_v49  ;;  %v1414_v25 = vpop.f32.mrb[5].mxu0 }
 0x1e3   : > { %v1415_v26 = vadd.f32 %v3915_v49, %v1414_v25  ;;  %v3236_v27 = vpop.f32.mrb[6].mxu0 }
 0x1e4   : > { %vm1467_vm11 = vcmp.ge.f32.partialorder %v1423_v24, 0.0  ;;  %v1489_v28 = vmul.f32 %v3920_v51, %v1423_v24  ;;  %v1426_v29 = vadd.f32 %v3236_v27, %v3915_v49  ;;  %v1417_v30 = vpop.f32.mrb[7].mxu0 }
 0x1e5   : > { %vm1465_vm12 = vcmp.ge.f32.partialorder %v1415_v26, 0.0  ;;  %v1487_v31 = vmul.f32 %v3920_v51, %v1415_v26  ;;  %v1418_v34 = vadd.f32 %v3915_v49, %v1417_v30 }
 0x1e6   : > { %v1505_v35 = vsel %vm1467_vm11, %v1423_v24, %v1489_v28  ;;  %vm1468_vm13 = vcmp.ge.f32.partialorder %v1426_v29, 0.0  ;;  %v1490_v36 = vmul.f32 %v3920_v51, %v1426_v29  ;;  %vm2319_vm11 = vcmask 261312  }
 0x1e7   : > { %v1537_v32 = vcombine.high %v1505_v35, %v1505_v35  ;;  %v3068_v33 = vrot.slane %v1505_v35, 9  ;;  %v3100_v37 = vrot.slane %v1505_v35, 10  ;;  %v1503_v38 = vsel %vm1465_vm12, %v1415_v26, %v1487_v31 }
 0x1e8   : > { %v1506_v39 = vsel %vm1468_vm13, %v1426_v29, %v1490_v36  ;;  %v3132_v44 = vrot.slane %v1505_v35, 11  ;;  %vm1466_vm15 = vcmp.ge.f32.partialorder %v1418_v34, 0.0  ;;  %v1535_v46 = vcombine.high %v1503_v38, %v1503_v38 }
 0x1e9   : > { %v3069_v42 = vrot.slane %v1537_v32, 9  ;;  %v1671_v43 = vmax.f32 %v1505_v35, %v3068_v33  ;;  %v3101_v45 = vrot.slane %v1537_v32, 10  ;;  %v3064_v47 = vrot.slane %v1503_v38, 9 }
 0x1ea   : > { %v1488_v48 = vmul.f32 %v3920_v51, %v1418_v34  ;;  %v1538_v53 = vcombine.high %v1506_v39, %v1506_v39  ;;  %v3070_v54 = vrot.slane %v1506_v39, 9  ;;  %v3133_v55 = vrot.slane %v1537_v32, 11 }
 0x1eb   : > { %v1672_v50 = vmax.f32 %v1537_v32, %v3069_v42  ;;  %v1799_v52 = vmax.f32 %v1671_v43, %v3100_v37  ;;  %v3065_v56 = vrot.slane %v1535_v46, 9  ;;  %v1667_v57 = vmax.f32 %v1503_v38, %v3064_v47 }
 0x1ec   : > { %v3096_v58 = vrot.slane %v1503_v38, 10  ;;  %v3071_v61 = vrot.slane %v1538_v53, 9  ;;  %v1673_v62 = vmax.f32 %v1506_v39, %v3070_v54  ;;  %v3097_v0 = vrot.slane %v1535_v46, 10 }
 0x1ed   : > { %v1800_v59 = vmax.f32 %v1672_v50, %v3101_v45  ;;  %v1927_v60 = vmax.f32 %v1799_v52, %v3132_v44  ;;  %v1668_v63 = vmax.f32 %v1535_v46, %v3065_v56  ;;  %v3129_v2 = vrot.slane %v1535_v46, 11 }
 0x1ee   : > { %v3102_v3 = vrot.slane %v1506_v39, 10  ;;  %v1795_v40 = vmax.f32 %v1667_v57, %v3096_v58  ;;  %v1674_v41 = vmax.f32 %v1538_v53, %v3071_v61  ;;  %v3103_v6 = vrot.slane %v1538_v53, 10 }
 0x1ef   : > { %v1928_v5 = vmax.f32 %v1800_v59, %v3133_v55  ;;  %v2044_v7 = vrot.slane %v1927_v60, %v3929_v4  ;;  %v1796_v8 = vmax.f32 %v1668_v63, %v3097_v0  ;;  %v3134_v10 = vrot.slane %v1506_v39, 11 }
 0x1f0   : > { %v1801_v9 = vmax.f32 %v1673_v62, %v3102_v3  ;;  %v1802_v12 = vmax.f32 %v1674_v41, %v3103_v6  ;;  %v3135_v13 = vrot.slane %v1538_v53, 11  ;;  %v1504_v14 = vsel %vm1466_vm15, %v1418_v34, %v1488_v48 }
 0x1f1   : > { %v2048_v11 = vrot.slane %v1928_v5, %v3929_v4  ;;  %2170 = vst.msk [vmem:[#allocation3 + $0x28] sm:$0x1] %vm2166_vm3, %v1928_v5  ;;  %v3128_v15 = vrot.slane %v1503_v38, 11  ;;  %v1924_v16 = vmax.f32 %v1796_v8, %v3129_v2  ;;  %v1536_v18 = vcombine.high %v1504_v14, %v1504_v14 }
 0x1f2   : > { %v1929_v17 = vmax.f32 %v1801_v9, %v3134_v10  ;;  %v1930_v20 = vmax.f32 %v1802_v12, %v3135_v13  ;;  %v3066_v21 = vrot.slane %v1504_v14, 9  ;;  %v3098_v27 = vrot.slane %v1504_v14, 10 }
 0x1f3   : > { %v2133_v19 = vsel %vm2121_vm4, %v2048_v11, %v2044_v7  ;;  %v1923_v22 = vmax.f32 %v1795_v40, %v3128_v15  ;;  %2169 = vst.msk [vmem:[#allocation3 + $0x20] sm:$0x1] %vm2166_vm3, %v1924_v16  ;;  %v3067_v24 = vrot.slane %v1536_v18, 9  ;;  %v2032_v28 = vrot.slane %v1924_v16, %v3929_v4 }
 0x1f4   : > { %v2052_v23 = vrot.slane %v1929_v17, %v3929_v4  ;;  %2178 = vst.msk [vmem:[#allocation3 + $0x2d] sm:$0x1] %vm2166_vm3, %v1929_v17  ;;  %v2056_v25 = vrot.slane %v1930_v20, %v3929_v4  ;;  %v1669_v26 = vmax.f32 %v1504_v14, %v3066_v21  ;;  %v3099_v31 = vrot.slane %v1536_v18, 10 }
 0x1f5   : > { %v1670_v30 = vmax.f32 %v1536_v18, %v3067_v24  ;;  %v3130_v36 = vrot.slane %v1504_v14, 11  ;;  %v2028_v32 = vrot.slane %v1923_v22, %v3929_v4  ;;  %v3131_v37 = vrot.slane %v1536_v18, 11 }
 0x1f6   : > { %v2134_v29 = vsel %vm2123_vm6, %v2052_v23, %v2133_v19  ;;  %v1797_v35 = vmax.f32 %v1669_v26, %v3098_v27  ;;  %vm2356_vm12 = vcmask 326912   ;;  %vm2393_vm13 = vcmask 392512  }
 0x1f7   : > { %v2135_v34 = vsel %vm2125_vm7, %v2056_v25, %v2134_v29  ;;  %v1798_v33 = vmax.f32 %v1670_v30, %v3099_v31  ;;  %v2130_v39 = vsel %vm2121_vm4, %v2032_v28, %v2028_v32  ;;  %vm2430_vm15 = vcmask 458112  }
 0x1f8   : > { %2161 = vst.msk [vmem:[#allocation3 + $0x29] sm:$0xf] %vm2157_vm14, %v2135_v34  ;;  %v1925_v38 = vmax.f32 %v1797_v35, %v3130_v36 }
 0x1f9   : > { %v1926_v42 = vmax.f32 %v1798_v33, %v3131_v37 }
 0x1fa   : > { %v2036_v43 = vrot.slane %v1925_v38, %v3929_v4  ;;  %2177 = vst.msk [vmem:[#allocation3 + $0x25] sm:$0x1] %vm2166_vm3, %v1925_v38 }
 0x1fb   : > { %v2040_v44 = vrot.slane %v1926_v42, %v3929_v4 }
 0x1fc   : > { %v2131_v45 = vsel %vm2123_vm6, %v2036_v43, %v2130_v39 }
 0x1fd   : > { %v2132_v46 = vsel %vm2125_vm7, %v2040_v44, %v2131_v45 }
 0x1fe   : > { %2160 = vst.msk [vmem:[#allocation3 + $0x21] sm:$0xf] %vm2157_vm14, %v2132_v46 }
 0x205   : > { %v3316_v47 = vld [vmem:[#allocation3 + $0x18] ss:$8 sps:$4 sm:$0xff]  }
 0x206   : > { %v3317_v48 = vld [vmem:[#allocation3 + $0x21] ss:$8 sps:$4 sm:$0xff]   ;;  %2309 = vrot.lane.b32.xlu1 %v3316_v47, %s3368_s15 }
 0x207   : > { %2236 = vrot.lane.b32.xlu0 %v3317_v48, %s3364_s29  ;;  %v3318_v50 = vld [vmem:[#allocation3 + $0x19] ss:$8 sps:$4 sm:$0xff]  }
 0x208   : > { %v3319_v52 = vld [vmem:[#allocation3 + $0x22] ss:$8 sps:$4 sm:$0xff]  }
 0x209   : > { %v3334_v53 = vld [vmem:[#allocation3 + $0x20] ss:$8 sps:$4 sm:$0xff]  }
 0x20a   : > { %2346 = vrot.lane.b32.xlu1 %v3318_v50, %s3370_s9  ;;  %2210 = vst.msk [vmem:[#allocation6 + $0x10] sm:$0xff] %vm4203_vm8, %v3334_v53  ;;  %v3320_v54 = vld [vmem:[#allocation3 + $0x1a] ss:$8 sps:$4 sm:$0xff]  }
 0x20b   : > { %2273 = vrot.lane.b32.xlu0 %v3319_v52, %s3366_s13  ;;  %v3321_v55 = vld [vmem:[#allocation3 + $0x20] ss:$8 sps:$4 sm:$0xff]  }
 0x20c   : > { %v3322_v56 = vld [vmem:[#allocation3 + $0x21] ss:$8 sps:$4 sm:$0xff]  }
 0x20d   : > { %v3323_v57 = vld [vmem:[#allocation3 + $0x22] ss:$8 sps:$4 sm:$0xff]  }
 0x20e   : > { %2383 = vrot.lane.b32.xlu1 %v3320_v54, %s3371_s30 }
 0x212   : > { %2420 = vrot.lane.b32.xlu1 %v3321_v55, %s3372_s14 }
 0x216   : > { %2457 = vrot.lane.b32.xlu1 %v3322_v56, %s3373_s16 }
 0x21a   : > { %2494 = vrot.lane.b32.xlu1 %v3323_v57, %s3374_s17 }
 0x221   : > { %v3239_v58 = vpop.f32.mrb[8].mxu0 }
 0x222   : > { %v1439_v59 = vadd.f32 %v3239_v58, %v3915_v49  ;;  %v1430_v60 = vpop.f32.mrb[9].mxu0 }
 0x223   : > { %v1431_v61 = vadd.f32 %v3915_v49, %v1430_v60  ;;  %v3240_v62 = vpop.f32.mrb[10].mxu0 }
 0x224   : > { %vm1471_vm0 = vcmp.ge.f32.partialorder %v1439_v59, 0.0  ;;  %v1493_v63 = vmul.f32 %v3920_v51, %v1439_v59  ;;  %v1442_v0 = vadd.f32 %v3240_v62, %v3915_v49  ;;  %v1433_v2 = vpop.f32.mrb[11].mxu0 }
 0x225   : > { %vm1469_vm1 = vcmp.ge.f32.partialorder %v1431_v61, 0.0  ;;  %v1491_v3 = vmul.f32 %v3920_v51, %v1431_v61  ;;  %v1434_v5 = vadd.f32 %v3915_v49, %v1433_v2 }
 0x226   : > { %v1509_v40 = vsel %vm1471_vm0, %v1439_v59, %v1493_v63  ;;  %vm1472_vm2 = vcmp.ge.f32.partialorder %v1442_v0, 0.0  ;;  %v1494_v41 = vmul.f32 %v3920_v51, %v1442_v0  ;;  %vm2467_vm0 = vcmask 523712  }
 0x227   : > { %v1541_v6 = vcombine.high %v1509_v40, %v1509_v40  ;;  %v3076_v7 = vrot.slane %v1509_v40, 9  ;;  %v3108_v8 = vrot.slane %v1509_v40, 10  ;;  %v1507_v9 = vsel %vm1469_vm1, %v1431_v61, %v1491_v3 }
 0x228   : > { %v1510_v10 = vsel %vm1472_vm2, %v1442_v0, %v1494_v41  ;;  %v3140_v13 = vrot.slane %v1509_v40, 11  ;;  %vm1470_vm5 = vcmp.ge.f32.partialorder %v1434_v5, 0.0  ;;  %v1539_v15 = vcombine.high %v1507_v9, %v1507_v9 }
 0x229   : > { %v3077_v11 = vrot.slane %v1541_v6, 9  ;;  %v1679_v12 = vmax.f32 %v1509_v40, %v3076_v7  ;;  %v3109_v14 = vrot.slane %v1541_v6, 10  ;;  %v3072_v16 = vrot.slane %v1507_v9, 9 }
 0x22a   : > { %v1492_v17 = vmul.f32 %v3920_v51, %v1434_v5  ;;  %v1542_v20 = vcombine.high %v1510_v10, %v1510_v10  ;;  %v3078_v21 = vrot.slane %v1510_v10, 9  ;;  %v3141_v22 = vrot.slane %v1541_v6, 11 }
 0x22b   : > { %v1680_v18 = vmax.f32 %v1541_v6, %v3077_v11  ;;  %v1807_v19 = vmax.f32 %v1679_v12, %v3108_v8  ;;  %v3073_v23 = vrot.slane %v1539_v15, 9  ;;  %v1675_v24 = vmax.f32 %v1507_v9, %v3072_v16 }
 0x22c   : > { %v3104_v25 = vrot.slane %v1507_v9, 10  ;;  %v3079_v28 = vrot.slane %v1542_v20, 9  ;;  %v1681_v29 = vmax.f32 %v1510_v10, %v3078_v21  ;;  %v3105_v31 = vrot.slane %v1539_v15, 10 }
 0x22d   : > { %v1808_v26 = vmax.f32 %v1680_v18, %v3109_v14  ;;  %v1935_v27 = vmax.f32 %v1807_v19, %v3140_v13  ;;  %v1676_v30 = vmax.f32 %v1539_v15, %v3073_v23  ;;  %v3137_v34 = vrot.slane %v1539_v15, 11 }
 0x22e   : > { %v3110_v35 = vrot.slane %v1510_v10, 10  ;;  %v1803_v32 = vmax.f32 %v1675_v24, %v3104_v25  ;;  %v1682_v33 = vmax.f32 %v1542_v20, %v3079_v28  ;;  %v3111_v37 = vrot.slane %v1542_v20, 10 }
 0x22f   : > { %v1936_v36 = vmax.f32 %v1808_v26, %v3141_v22  ;;  %v2076_v38 = vrot.slane %v1935_v27, %v3929_v4  ;;  %v1804_v39 = vmax.f32 %v1676_v30, %v3105_v31  ;;  %v3142_v43 = vrot.slane %v1510_v10, 11 }
 0x230   : > { %v1809_v42 = vmax.f32 %v1681_v29, %v3110_v35  ;;  %v1810_v45 = vmax.f32 %v1682_v33, %v3111_v37  ;;  %v3143_v46 = vrot.slane %v1542_v20, 11  ;;  %v1508_v47 = vsel %vm1470_vm5, %v1434_v5, %v1492_v17 }
 0x231   : > { %v2080_v44 = vrot.slane %v1936_v36, %v3929_v4  ;;  %2172 = vst.msk [vmem:[#allocation3 + $0x38] sm:$0x1] %vm2166_vm3, %v1936_v36  ;;  %v3136_v48 = vrot.slane %v1507_v9, 11  ;;  %v1932_v50 = vmax.f32 %v1804_v39, %v3137_v34  ;;  %v1540_v53 = vcombine.high %v1508_v47, %v1508_v47 }
 0x232   : > { %v1937_v52 = vmax.f32 %v1809_v42, %v3142_v43  ;;  %v1938_v55 = vmax.f32 %v1810_v45, %v3143_v46  ;;  %v3074_v56 = vrot.slane %v1508_v47, 9  ;;  %v3106_v62 = vrot.slane %v1508_v47, 10 }
 0x233   : > { %v2139_v54 = vsel %vm2121_vm4, %v2080_v44, %v2076_v38  ;;  %v1931_v57 = vmax.f32 %v1803_v32, %v3136_v48  ;;  %2171 = vst.msk [vmem:[#allocation3 + $0x30] sm:$0x1] %vm2166_vm3, %v1932_v50  ;;  %v3075_v59 = vrot.slane %v1540_v53, 9  ;;  %v2064_v63 = vrot.slane %v1932_v50, %v3929_v4 }
 0x234   : > { %v2084_v58 = vrot.slane %v1937_v52, %v3929_v4  ;;  %2180 = vst.msk [vmem:[#allocation3 + $0x3d] sm:$0x1] %vm2166_vm3, %v1937_v52  ;;  %v2088_v60 = vrot.slane %v1938_v55, %v3929_v4  ;;  %v1677_v61 = vmax.f32 %v1508_v47, %v3074_v56  ;;  %v3107_v3 = vrot.slane %v1540_v53, 10 }
 0x235   : > { %v1678_v2 = vmax.f32 %v1540_v53, %v3075_v59  ;;  %v3138_v41 = vrot.slane %v1508_v47, 11  ;;  %v2060_v6 = vrot.slane %v1931_v57, %v3929_v4  ;;  %v3139_v8 = vrot.slane %v1540_v53, 11 }
 0x236   : > { %v2140_v0 = vsel %vm2123_vm6, %v2084_v58, %v2139_v54  ;;  %v1805_v40 = vmax.f32 %v1677_v61, %v3106_v62  ;;  %vm4204_vm1 = vcmask 589312  }
 0x237   : > { %v2141_v5 = vsel %vm2125_vm7, %v2088_v60, %v2140_v0  ;;  %v1806_v7 = vmax.f32 %v1678_v2, %v3107_v3  ;;  %v2136_v10 = vsel %vm2121_vm4, %v2064_v63, %v2060_v6 }
 0x238   : > { %2163 = vst.msk [vmem:[#allocation3 + $0x39] sm:$0xf] %vm2157_vm14, %v2141_v5  ;;  %v1933_v9 = vmax.f32 %v1805_v40, %v3138_v41  ;;  %v2235_v12 = vpop.permute.xlu1 %2234 }
 0x239   : > { %v1934_v11 = vmax.f32 %v1806_v7, %v3139_v8  ;;  %2246 = vst.msk [vmem:[#allocation6 + $0x8] sm:$0xff] %vm2244_vm9, %v2235_v12  ;;  %v2308_v14 = vpop.permute.xlu0 %2307 }
 0x23a   : > { %v2068_v13 = vrot.slane %v1933_v9, %v3929_v4  ;;  %2179 = vst.msk [vmem:[#allocation3 + $0x35] sm:$0x1] %vm2166_vm3, %v1933_v9 }
 0x23b   : > { %v2072_v15 = vrot.slane %v1934_v11, %v3929_v4  ;;  %2320 = vst.msk [vmem:[#allocation6] sm:$0xff] %vm2319_vm11, %v2308_v14 }
 0x23c   : > { %v2137_v16 = vsel %vm2123_vm6, %v2068_v13, %v2136_v10  ;;  %v2272_v18 = vpop.permute.xlu1 %2271 }
 0x23d   : > { %v2138_v17 = vsel %vm2125_vm7, %v2072_v15, %v2137_v16  ;;  %2283 = vst.msk [vmem:[#allocation6 + $0x8] sm:$0xff] %vm2281_vm10, %v2272_v18  ;;  %v2345_v19 = vpop.permute.xlu0 %2344 }
 0x23e   : > { %2162 = vst.msk [vmem:[#allocation3 + $0x31] sm:$0xf] %vm2157_vm14, %v2138_v17 }
 0x23f   : > { %2357 = vst.msk [vmem:[#allocation6] sm:$0xff] %vm2356_vm12, %v2345_v19 }
 0x241   : > { %v2382_v20 = vpop.permute.xlu0 %2381 }
 0x242   : > { %2394 = vst.msk [vmem:[#allocation6] sm:$0xff] %vm2393_vm13, %v2382_v20 }
 0x245   : > { %v3326_v21 = vld [vmem:[#allocation3 + $0x31] ss:$8 sps:$4 sm:$0xff]   ;;  %v2419_v22 = vpop.permute.xlu0 %2418 }
 0x246   : > { %v3327_v23 = vld [vmem:[#allocation3 + $0x28] ss:$8 sps:$4 sm:$0xff]   ;;  %2431 = vst.msk [vmem:[#allocation6] sm:$0xff] %vm2430_vm15, %v2419_v22  ;;  %2238 = vrot.lane.b32.xlu1 %v3326_v21, %s3364_s29 }
 0x247   : > { %2311 = vrot.lane.b32.xlu0 %v3327_v23, %s3368_s15  ;;  %v3328_v24 = vld [vmem:[#allocation3 + $0x32] ss:$8 sps:$4 sm:$0xff]  }
 0x248   : > { %v3329_v26 = vld [vmem:[#allocation3 + $0x29] ss:$8 sps:$4 sm:$0xff]  }
 0x249   : > { %v2456_v25 = vpop.permute.xlu0 %2455  ;;  %v3341_v27 = vld [vmem:[#allocation3 + $0x30] ss:$8 sps:$4 sm:$0xff]  }
 0x24a   : > { %2468 = vst.msk [vmem:[#allocation6] sm:$0xff] %vm2467_vm0, %v2456_v25  ;;  %2275 = vrot.lane.b32.xlu1 %v3328_v24, %s3366_s13  ;;  %v3330_v29 = vld [vmem:[#allocation3 + $0x2a] ss:$8 sps:$4 sm:$0xff]  }
 0x24b   : > { %2348 = vrot.lane.b32.xlu0 %v3329_v26, %s3370_s9  ;;  %2211 = vst.msk [vmem:[#allocation6 + $0x18] sm:$0xff] %vm4203_vm8, %v3341_v27  ;;  %v3331_v30 = vld [vmem:[#allocation3 + $0x30] ss:$8 sps:$4 sm:$0xff]  }
 0x24c   : > { %v3332_v31 = vld [vmem:[#allocation3 + $0x31] ss:$8 sps:$4 sm:$0xff]  }
 0x24d   : > { %v2493_v28 = vpop.permute.xlu0 %2492  ;;  %v3333_v34 = vld [vmem:[#allocation3 + $0x32] ss:$8 sps:$4 sm:$0xff]  }
 0x24e   : > { %2505 = vst.msk [vmem:[#allocation6] sm:$0xff] %vm4204_vm1, %v2493_v28 }
 0x24f   : > { %2385 = vrot.lane.b32.xlu0 %v3330_v29, %s3371_s30 }
 0x253   : > { %2422 = vrot.lane.b32.xlu0 %v3331_v30, %s3372_s14 }
 0x257   : > { %2459 = vrot.lane.b32.xlu0 %v3332_v31, %s3373_s16 }
 0x25b   : > { %2496 = vrot.lane.b32.xlu0 %v3333_v34, %s3374_s17 }
 0x25d   : > { %v3243_v35 = vpop.f32.mrb[12].mxu0 }
 0x25e   : > { %v1455_v36 = vadd.f32 %v3243_v35, %v3915_v49  ;;  %v1446_v32 = vpop.f32.mrb[13].mxu0 }
 0x25f   : > { %v1447_v33 = vadd.f32 %v3915_v49, %v1446_v32  ;;  %v3244_v37 = vpop.f32.mrb[14].mxu0 }
 0x260   : > { %vm1475_vm2 = vcmp.ge.f32.partialorder %v1455_v36, 0.0  ;;  %v1497_v38 = vmul.f32 %v3920_v51, %v1455_v36  ;;  %v1458_v39 = vadd.f32 %v3244_v37, %v3915_v49  ;;  %v1449_v42 = vpop.f32.mrb[15].mxu0 }
 0x261   : > { %vm1473_vm5 = vcmp.ge.f32.partialorder %v1447_v33, 0.0  ;;  %v1495_v43 = vmul.f32 %v3920_v51, %v1447_v33  ;;  %v1450_v44 = vadd.f32 %v3915_v49, %v1449_v42 }
 0x262   : > { %v1513_v45 = vsel %vm1475_vm2, %v1455_v36, %v1497_v38  ;;  %vm1476_vm8 = vcmp.ge.f32.partialorder %v1458_v39, 0.0  ;;  %v1498_v46 = vmul.f32 %v3920_v51, %v1458_v39 }
 0x263   : > { %v1545_v47 = vcombine.high %v1513_v45, %v1513_v45  ;;  %v3084_v48 = vrot.slane %v1513_v45, 9  ;;  %v3116_v50 = vrot.slane %v1513_v45, 10  ;;  %v1511_v52 = vsel %vm1473_vm5, %v1447_v33, %v1495_v43 }
 0x264   : > { %v1514_v53 = vsel %vm1476_vm8, %v1458_v39, %v1498_v46  ;;  %v3148_v56 = vrot.slane %v1513_v45, 11  ;;  %vm1474_vm1 = vcmp.ge.f32.partialorder %v1450_v44, 0.0  ;;  %v1543_v58 = vcombine.high %v1511_v52, %v1511_v52 }
 0x265   : > { %v3085_v54 = vrot.slane %v1545_v47, 9  ;;  %v1687_v55 = vmax.f32 %v1513_v45, %v3084_v48  ;;  %v3117_v57 = vrot.slane %v1545_v47, 10  ;;  %v3080_v59 = vrot.slane %v1511_v52, 9 }
 0x266   : > { %v1496_v60 = vmul.f32 %v3920_v51, %v1450_v44  ;;  %v1546_v62 = vcombine.high %v1514_v53, %v1514_v53  ;;  %v3086_v63 = vrot.slane %v1514_v53, 9  ;;  %v3149_v0 = vrot.slane %v1545_v47, 11 }
 0x267   : > { %v1688_v61 = vmax.f32 %v1545_v47, %v3085_v54  ;;  %v1815_v49 = vmax.f32 %v1687_v55, %v3116_v50  ;;  %v3081_v2 = vrot.slane %v1543_v58, 9  ;;  %v1683_v3 = vmax.f32 %v1511_v52, %v3080_v59 }
 0x268   : > { %v3112_v5 = vrot.slane %v1511_v52, 10  ;;  %v3087_v6 = vrot.slane %v1546_v62, 9  ;;  %v1689_v7 = vmax.f32 %v1514_v53, %v3086_v63  ;;  %v3113_v9 = vrot.slane %v1543_v58, 10 }
 0x269   : > { %v1816_v40 = vmax.f32 %v1688_v61, %v3117_v57  ;;  %v1943_v41 = vmax.f32 %v1815_v49, %v3148_v56  ;;  %v1684_v8 = vmax.f32 %v1543_v58, %v3081_v2  ;;  %v3145_v10 = vrot.slane %v1543_v58, 11  ;;  %v3342_v61 = vld [vmem:[%s4194_s4] sm:$0xff]   ;;  %v3343_v2 = vld [vmem:[%s4194_s4 + $0x8] sm:$0xff]  }
 0x26a   : > { %v3118_v11 = vrot.slane %v1514_v53, 10  ;;  %v1811_v13 = vmax.f32 %v1683_v3, %v3112_v5  ;;  %v1690_v14 = vmax.f32 %v1546_v62, %v3087_v6  ;;  %v3119_v51 = vrot.slane %v1546_v62, 10  ;;  %3245 = vmatprep.subr.bf16.mxu1 %v3342_v61  ;;  %v3344_v3 = vld [vmem:[%s4194_s4 + $0x10] sm:$0xff]  }
 0x26b   : > { %v1944_v12 = vmax.f32 %v1816_v40, %v3149_v0  ;;  %v2108_v15 = vrot.slane %v1943_v41, %v3929_v4  ;;  %v1812_v16 = vmax.f32 %v1684_v8, %v3113_v9  ;;  %v3150_v18 = vrot.slane %v1514_v53, 11  ;;  %3246 = vmatpush3.bf16.msra.mxu1 %v3342_v61  ;;  %v3345_v41 = vld [vmem:[%s4194_s4 + $0x18] sm:$0xff]   ;;  %v3346_v8 = vld [vmem:[%s4194_s4 + $0x20] ss:$0 sps:$4 sm:$0xff]  }
 0x26c   : > { %v1817_v17 = vmax.f32 %v1689_v7, %v3118_v11  ;;  %v1818_v20 = vmax.f32 %v1690_v14, %v3119_v51  ;;  %v3151_v21 = vrot.slane %v1546_v62, 11  ;;  %v1512_v22 = vsel %vm1474_vm1, %v1450_v44, %v1496_v60  ;;  %3247 = vmatprep.subr.bf16.mxu1 %v3343_v2 }
 0x26d   : > { %v2112_v19 = vrot.slane %v1944_v12, %v3929_v4  ;;  %2174 = vst.msk [vmem:[#allocation3 + $0x48] sm:$0x1] %vm2166_vm3, %v1944_v12  ;;  %v3144_v23 = vrot.slane %v1511_v52, 11  ;;  %v1940_v24 = vmax.f32 %v1812_v16, %v3145_v10  ;;  %v1544_v26 = vcombine.high %v1512_v22, %v1512_v22  ;;  %v2509_v12 = vld [vmem:[#allocation6] sm:$0xff] }
 0x26e   : > { %v1945_v25 = vmax.f32 %v1817_v17, %v3150_v18  ;;  %v1946_v28 = vmax.f32 %v1818_v20, %v3151_v21  ;;  %v3082_v29 = vrot.slane %v1512_v22, 9  ;;  %v3114_v32 = vrot.slane %v1512_v22, 10 }
 0x26f   : > { %v2145_v27 = vsel %vm2121_vm4, %v2112_v19, %v2108_v15  ;;  %v1939_v30 = vmax.f32 %v1811_v13, %v3144_v23  ;;  %2173 = vst.msk [vmem:[#allocation3 + $0x40] sm:$0x1] %vm2166_vm3, %v1940_v24  ;;  %v3083_v34 = vrot.slane %v1544_v26, 9  ;;  %v2096_v33 = vrot.slane %v1940_v24, %v3929_v4  ;;  %3248 = vmatpush3.bf16.msra.mxu1 %v3343_v2 }
 0x270   : > { %v2116_v31 = vrot.slane %v1945_v25, %v3929_v4  ;;  %2182 = vst.msk [vmem:[#allocation3 + $0x4d] sm:$0x1] %vm2166_vm3, %v1945_v25  ;;  %v2120_v35 = vrot.slane %v1946_v28, %v3929_v4  ;;  %v1685_v36 = vmax.f32 %v1512_v22, %v3082_v29  ;;  %v3115_v39 = vrot.slane %v1544_v26, 10  ;;  %3249 = vmatprep.subr.bf16.mxu1 %v3344_v3 }
 0x271   : > { %v1686_v38 = vmax.f32 %v1544_v26, %v3083_v34  ;;  %v3146_v44 = vrot.slane %v1512_v22, 11  ;;  %v2092_v45 = vrot.slane %v1939_v30, %v3929_v4  ;;  %v3147_v47 = vrot.slane %v1544_v26, 11  ;;  %v3160_v34 = vld [vmem:[%s4196_s6] ss:$0 sm:$0xff] }
 0x272   : > { %v2146_v37 = vsel %vm2123_vm6, %v2116_v31, %v2145_v27  ;;  %v1813_v43 = vmax.f32 %v1685_v36, %v3114_v32  ;;  %vm2548_vm8 = vcmask 588800   ;;  %v3152_v31 = vld [vmem:[%s4195_s5] ss:$0 sm:$0xff]  ;;  %vm2792_vm5 = vcmask 1045509  }
 0x273   : > { %v2147_v42 = vsel %vm2125_vm7, %v2120_v35, %v2146_v37  ;;  %v1814_v46 = vmax.f32 %v1686_v38, %v3115_v39  ;;  %v2142_v50 = vsel %vm2121_vm4, %v2096_v33, %v2092_v45  ;;  %3250 = vmatpush3.bf16.msra.mxu1 %v3344_v3 }
 0x274   : > { %2165 = vst.msk [vmem:[#allocation3 + $0x49] sm:$0xf] %vm2157_vm14, %v2147_v42  ;;  %v1941_v48 = vmax.f32 %v1813_v43, %v3146_v44  ;;  %3251 = vmatprep.subr.bf16.mxu1 %v3345_v41 }
 0x275   : > { %v1942_v52 = vmax.f32 %v1814_v46, %v3147_v47 }
 0x276   : > { %v2100_v53 = vrot.slane %v1941_v48, %v3929_v4  ;;  %2181 = vst.msk [vmem:[#allocation3 + $0x45] sm:$0x1] %vm2166_vm3, %v1941_v48  ;;  %vm2555_vm3 = vcmask 1043456  }
 0x277   : > { %v2104_v54 = vrot.slane %v1942_v52, %v3929_v4  ;;  %3252 = vmatpush3.bf16.msra.mxu1 %v3345_v41  ;;  %v2557_v10 = vsel %vm2555_vm3, %v3346_v8, 0 }
 0x278   : > { %v2143_v55 = vsel %vm2123_vm6, %v2100_v53, %v2142_v50  ;;  %v2310_v57 = vpop.permute.xlu1 %2309  ;;  %3278 = vmatprep.subr.msk.bf16.mxu1 %vm2555_vm3, %v3346_v8 }
 0x279   : > { %v2144_v56 = vsel %vm2125_vm7, %v2104_v54, %v2143_v55  ;;  %2321 = vst.msk [vmem:[#allocation6 + $0x8] sm:$0xff] %vm2319_vm11, %v2310_v57  ;;  %v2237_v58 = vpop.permute.xlu0 %2236 }
 0x27a   : > { %2164 = vst.msk [vmem:[#allocation3 + $0x41] sm:$0xf] %vm2157_vm14, %v2144_v56  ;;  %vm4205_vm14 = vcmask 589312  }
 0x27b   : > { %2247 = vst.msk [vmem:[#allocation6 + $0x10] sm:$0xff] %vm2244_vm9, %v2237_v58  ;;  %3254 = vmatpush3.bf16.msra.mxu1 %v2557_v10  ;;  %vm4206_vm1 = vmmov %vm4205_vm14 }
 0x27c   : > { %v2347_v59 = vpop.permute.xlu1 %2346  ;;  %3259 = vmatprep.subr.bf16.mxu1 %v3362_v1  ;;  %vm4207_vm2 = vmmov %vm4206_vm1 }
 0x27d   : > { %2358 = vst.msk [vmem:[#allocation6 + $0x8] sm:$0xff] %vm2356_vm12, %v2347_v59  ;;  %v2274_v60 = vpop.permute.xlu0 %2273 }
 0x27e   : > { %2284 = vst.msk [vmem:[#allocation6 + $0x10] sm:$0xff] %vm2281_vm10, %v2274_v60 }
 0x280   : > { %v2384_v49 = vpop.permute.xlu1 %2383 }
 0x281   : > { %v3335_v62 = vld [vmem:[#allocation3 + $0x38] ss:$8 sps:$4 sm:$0xff]   ;;  %2395 = vst.msk [vmem:[#allocation6 + $0x8] sm:$0xff] %vm2393_vm13, %v2384_v49 }
 0x282   : > { %2313 = vrot.lane.b32.xlu1 %v3335_v62, %s3368_s15  ;;  %v3336_v0 = vld [vmem:[#allocation3 + $0x39] ss:$8 sps:$4 sm:$0xff]  }
 0x283   : > { %v3337_v40 = vld [vmem:[#allocation3 + $0x3a] ss:$8 sps:$4 sm:$0xff]  }
 0x284   : > { %v2421_v63 = vpop.permute.xlu1 %2420  ;;  %v3338_v7 = vld [vmem:[#allocation3 + $0x40] ss:$8 sps:$4 sm:$0xff]  }
 0x285   : > { %2432 = vst.msk [vmem:[#allocation6 + $0x8] sm:$0xff] %vm2430_vm15, %v2421_v63  ;;  %v3339_v9 = vld [vmem:[#allocation3 + $0x41] ss:$8 sps:$4 sm:$0xff]  }
 0x286   : > { %2350 = vrot.lane.b32.xlu1 %v3336_v0, %s3370_s9  ;;  %v3340_v11 = vld [vmem:[#allocation3 + $0x42] ss:$8 sps:$4 sm:$0xff]  }
 0x288   : > { %v2458_v5 = vpop.permute.xlu1 %2457 }
 0x289   : > { %2469 = vst.msk [vmem:[#allocation6 + $0x8] sm:$0xff] %vm2467_vm0, %v2458_v5 }
 0x28a   : > { %2387 = vrot.lane.b32.xlu1 %v3337_v40, %s3371_s30 }
 0x28c   : > { %v2495_v6 = vpop.permute.xlu1 %2494 }
 0x28d   : > { %2506 = vst.msk [vmem:[#allocation6 + $0x8] sm:$0xff] %vm4205_vm14, %v2495_v6  ;;  %vm2794_vm14 = vcmask 1046534  }
 0x28e   : > { %2424 = vrot.lane.b32.xlu1 %v3338_v7, %s3372_s14 }
 0x292   : > { %2461 = vrot.lane.b32.xlu1 %v3339_v9, %s3373_s16 }
 0x294   : > { %v2510_v13 = vld [vmem:[#allocation6 + $0x8] sm:$0xff] }
 0x295   : > { %v2513_v14 = vpack.c.bf16 %v2510_v13, %v2509_v12 }
 0x296   : > { %2498 = vrot.lane.b32.xlu1 %v3340_v11, %s3374_s17 }
 0x297   : > { %3255 = vmatprep.mubr.msk.bf16.mxu1 %vm2548_vm8, %v2513_v14 }
 0x2b8   : > { %v2239_v51 = vpop.permute.xlu1 %2238 }
 0x2b9   : > { %2248 = vst.msk [vmem:[#allocation6 + $0x18] sm:$0xff] %vm2244_vm9, %v2239_v51  ;;  %v2312_v15 = vpop.permute.xlu0 %2311 }
 0x2ba   : > { %2322 = vst.msk [vmem:[#allocation6 + $0x10] sm:$0xff] %vm2319_vm11, %v2312_v15 }
 0x2bc   : > { %v2276_v16 = vpop.permute.xlu1 %2275 }
 0x2bd   : > { %2285 = vst.msk [vmem:[#allocation6 + $0x18] sm:$0xff] %vm2281_vm10, %v2276_v16  ;;  %v2349_v17 = vpop.permute.xlu0 %2348 }
 0x2be   : > { %2359 = vst.msk [vmem:[#allocation6 + $0x10] sm:$0xff] %vm2356_vm12, %v2349_v17 }
 0x2c1   : > { %v2386_v18 = vpop.permute.xlu0 %2385 }
 0x2c2   : > { %2396 = vst.msk [vmem:[#allocation6 + $0x10] sm:$0xff] %vm2393_vm13, %v2386_v18 }
 0x2c5   : > { %v2423_v19 = vpop.permute.xlu0 %2422 }
 0x2c6   : > { %2433 = vst.msk [vmem:[#allocation6 + $0x10] sm:$0xff] %vm2430_vm15, %v2423_v19 }
 0x2c9   : > { %v2460_v20 = vpop.permute.xlu0 %2459 }
 0x2ca   : > { %2470 = vst.msk [vmem:[#allocation6 + $0x10] sm:$0xff] %vm2467_vm0, %v2460_v20 }
 0x2cd   : > { %v2497_v21 = vpop.permute.xlu0 %2496 }
 0x2ce   : > { %2507 = vst.msk [vmem:[#allocation6 + $0x10] sm:$0xff] %vm4206_vm1, %v2497_v21  ;;  %vm2890_vm1 = vcmask 125952  }
 0x2cf   : > { %2891 = vst.msk [vmem:[#allocation5] sm:$0xf] %vm2890_vm1, %v3362_v1 }
 0x2d5   : > { %v2511_v28 = vld [vmem:[#allocation6 + $0x10] sm:$0xff] }
 0x2f4   : > { %v2314_v22 = vpop.permute.xlu1 %2313 }
 0x2f5   : > { %2323 = vst.msk [vmem:[#allocation6 + $0x18] sm:$0xff] %vm2319_vm11, %v2314_v22 }
 0x2f8   : > { %v2351_v23 = vpop.permute.xlu1 %2350 }
 0x2f9   : > { %2360 = vst.msk [vmem:[#allocation6 + $0x18] sm:$0xff] %vm2356_vm12, %v2351_v23 }
 0x2fc   : > { %v2388_v24 = vpop.permute.xlu1 %2387 }
 0x2fd   : > { %2397 = vst.msk [vmem:[#allocation6 + $0x18] sm:$0xff] %vm2393_vm13, %v2388_v24 }
 0x300   : > { %v2425_v25 = vpop.permute.xlu1 %2424 }
 0x301   : > { %2434 = vst.msk [vmem:[#allocation6 + $0x18] sm:$0xff] %vm2430_vm15, %v2425_v25 }
 0x304   : > { %v2462_v26 = vpop.permute.xlu1 %2461 }
 0x305   : > { %2471 = vst.msk [vmem:[#allocation6 + $0x18] sm:$0xff] %vm2467_vm0, %v2462_v26  ;;  %vm2790_vm0 = vcmask 1044484  }
 0x308   : > { %v2499_v27 = vpop.permute.xlu1 %2498 }
 0x309   : > { %2508 = vst.msk [vmem:[#allocation6 + $0x18] sm:$0xff] %vm4207_vm2, %v2499_v27  ;;  %vm2901_vm2 = vcmask 261248  }
 0x310   : > { %v2512_v29 = vld [vmem:[#allocation6 + $0x18] sm:$0xff] }
 0x311   : > { %v2514_v30 = vpack.c.bf16 %v2512_v29, %v2511_v28 }
 0x313   : > { %3256 = vmatmul.mubr.msk.bf16.vlgmr.msra.gmra.mrb[0].mxu1 %vm2548_vm8, %v2514_v30 }
 0x3e6   : > { %v3257_v35 = vpop.f32.mrb[0].mxu1 }
 0x3e7   : > { %v2602_v36 = vadd.f32 %v3257_v35, %v3152_v31  ;;  %v2593_v32 = vpop.f32.mrb[1].mxu1 }
 0x3e8   : > { %v2594_v33 = vadd.f32 %v3152_v31, %v2593_v32  ;;  %v3258_v37 = vpop.f32.mrb[2].mxu1 }
 0x3e9   : > { %vm2610_vm11 = vcmp.ge.f32.partialorder %v2602_v36, 0.0  ;;  %v2620_v38 = vmul.f32 %v3160_v34, %v2602_v36  ;;  %v2605_v39 = vadd.f32 %v3258_v37, %v3152_v31  ;;  %v2596_v42 = vpop.f32.mrb[3].mxu1 }
 0x3ea   : > { %vm2608_vm12 = vcmp.ge.f32.partialorder %v2594_v33, 0.0  ;;  %v2618_v43 = vmul.f32 %v3160_v34, %v2594_v33  ;;  %v2597_v50 = vadd.f32 %v3152_v31, %v2596_v42 }
 0x3eb   : > { %v2624_v44 = vsel %vm2610_vm11, %v2602_v36, %v2620_v38  ;;  %vm2611_vm13 = vcmp.ge.f32.partialorder %v2605_v39, 0.0  ;;  %v2621_v45 = vmul.f32 %v3160_v34, %v2605_v39  ;;  %vm2908_vm11 = vcmask 392448  }
 0x3ec   : > { %v2622_v46 = vsel %vm2608_vm12, %v2594_v33, %v2618_v43  ;;  %v2632_v47 = vcombine.high %v2624_v44, %v2624_v44  ;;  %v3165_v54 = vrot.slane %v2624_v44, 9  ;;  %v2619_v59 = vmul.f32 %v3160_v34, %v2597_v50 }
 0x3ed   : > { %v2625_v48 = vsel %vm2611_vm13, %v2605_v39, %v2621_v45  ;;  %v2630_v52 = vcombine.high %v2622_v46, %v2622_v46  ;;  %v3161_v53 = vrot.slane %v2622_v46, 9  ;;  %v3169_v61 = vrot.slane %v2622_v46, 10 }
 0x3ee   : > { %v2633_v57 = vcombine.high %v2625_v48, %v2625_v48  ;;  %v3166_v58 = vrot.slane %v2632_v47, 9  ;;  %vm2609_vm15 = vcmp.ge.f32.partialorder %v2597_v50, 0.0  ;;  %v2666_v62 = vmax.f32 %v2624_v44, %v3165_v54  ;;  %v3347_v54 = vld [vmem:[%s4197_s7] sm:$0xff]  }
 0x3ef   : > { %v3162_v55 = vrot.slane %v2630_v52, 9  ;;  %v2662_v56 = vmax.f32 %v2622_v46, %v3161_v53  ;;  %v3170_v49 = vrot.slane %v2630_v52, 10  ;;  %v3167_v63 = vrot.slane %v2625_v48, 9  ;;  %3260 = vmatpush3.bf16.msra.mxu1 %v3347_v54 }
 0x3f0   : > { %v3178_v3 = vrot.slane %v2630_v52, 11  ;;  %v3168_v5 = vrot.slane %v2633_v57, 9  ;;  %v2667_v40 = vmax.f32 %v2632_v47, %v3166_v58  ;;  %v2623_v41 = vsel %vm2609_vm15, %v2597_v50, %v2619_v59  ;;  %3261 = vmatprep.subr.bf16.mxu1 %v3362_v1 }
 0x3f1   : > { %v2663_v60 = vmax.f32 %v2630_v52, %v3162_v55  ;;  %v2694_v0 = vmax.f32 %v2662_v56, %v3169_v61  ;;  %v3173_v6 = vrot.slane %v2624_v44, 10  ;;  %v3177_v7 = vrot.slane %v2622_v46, 11  ;;  %v3348_v55 = vld [vmem:[%s4197_s7 + $0x8] ss:$0 sps:$4 sm:$0xff]  }
 0x3f2   : > { %v2631_v9 = vcombine.high %v2623_v41, %v2623_v41  ;;  %v3174_v10 = vrot.slane %v2632_v47, 10  ;;  %v3181_v11 = vrot.slane %v2624_v44, 11  ;;  %v2668_v12 = vmax.f32 %v2625_v48, %v3167_v63  ;;  %v3189_v63 = vld [vmem:[#allocation7] ss:$0 sm:$0xff] }
 0x3f3   : > { %v2695_v2 = vmax.f32 %v2663_v60, %v3170_v49  ;;  %v3163_v13 = vrot.slane %v2623_v41, 9  ;;  %v2698_v14 = vmax.f32 %v2666_v62, %v3173_v6  ;;  %v2726_v51 = vmax.f32 %v2694_v0, %v3177_v7 }
 0x3f4   : > { %v2669_v15 = vmax.f32 %v2633_v57, %v3168_v5  ;;  %v3164_v16 = vrot.slane %v2631_v9, 9  ;;  %v2699_v17 = vmax.f32 %v2667_v40, %v3174_v10  ;;  %v3175_v18 = vrot.slane %v2625_v48, 10  ;;  %v3185_v40 = vld [vmem:[%s4198_s8] ss:$0 sm:$0xff] }
 0x3f5   : > { %v2727_v8 = vmax.f32 %v2695_v2, %v3178_v3  ;;  %v2664_v19 = vmax.f32 %v2623_v41, %v3163_v13  ;;  %v3171_v20 = vrot.slane %v2623_v41, 10  ;;  %v3176_v22 = vrot.slane %v2633_v57, 10 }
 0x3f6   : > { %v2665_v23 = vmax.f32 %v2631_v9, %v3164_v16  ;;  %v3172_v24 = vrot.slane %v2631_v9, 10  ;;  %v3182_v25 = vrot.slane %v2632_v47, 11  ;;  %v2700_v26 = vmax.f32 %v2668_v12, %v3175_v18 }
 0x3f7   : > { %v2762_v21 = vrot.slane %v2727_v8, %v3929_v4  ;;  %v2696_v27 = vmax.f32 %v2664_v19, %v3171_v20  ;;  %v3179_v28 = vrot.slane %v2623_v41, 11  ;;  %v2758_v29 = vrot.slane %v2726_v51, %v3929_v4  ;;  %v3351_v51 = vld [vmem:[%s4200_s10 + $0x10] sm:$0xff]  }
 0x3f8   : > { %v2701_v30 = vmax.f32 %v2669_v15, %v3176_v22  ;;  %v2697_v31 = vmax.f32 %v2665_v23, %v3172_v24  ;;  %v3180_v34 = vrot.slane %v2631_v9, 11  ;;  %v2730_v35 = vmax.f32 %v2698_v14, %v3181_v11  ;;  %v3349_v9 = vld [vmem:[%s4200_s10] sm:$0xff]   ;;  %v3350_v14 = vld [vmem:[%s4200_s10 + $0x8] sm:$0xff]  }
 0x3f9   : > { %v3183_v36 = vrot.slane %v2625_v48, 11  ;;  %v2728_v32 = vmax.f32 %v2696_v27, %v3179_v28  ;;  %v2731_v33 = vmax.f32 %v2699_v17, %v3182_v25  ;;  %v2787_v37 = vsel %vm2121_vm4, %v2762_v21, %v2758_v29 }
 0x3fa   : > { %v3184_v38 = vrot.slane %v2633_v57, 11  ;;  %v2729_v39 = vmax.f32 %v2697_v31, %v3180_v34  ;;  %v2774_v46 = vrot.slane %v2730_v35, %v3929_v4  ;;  %vm2796_vm4 = vcmask 1047559  }
 0x3fb   : > { %v2732_v42 = vmax.f32 %v2700_v26, %v3183_v36  ;;  %v2766_v43 = vrot.slane %v2728_v32, %v3929_v4  ;;  %v2778_v48 = vrot.slane %v2731_v33, %v3929_v4  ;;  %v2836_v60 = vsel %vm2555_vm3, %v3348_v55, 0 }
 0x3fc   : > { %v2733_v44 = vmax.f32 %v2701_v30, %v3184_v38  ;;  %v2770_v45 = vrot.slane %v2729_v39, %v3929_v4  ;;  %3262 = vmatpush3.bf16.msra.mxu1 %v2836_v60  ;;  %v3376_v62 = vmov 0   ;;  %vm2831_vm3 = vcmask 195584  }
 0x3fd   : > { %v2788_v47 = vsel %vm2123_vm6, %v2766_v43, %v2787_v37  ;;  %v2782_v52 = vrot.slane %v2732_v42, %v3929_v4  ;;  %vm3375_vm6 = vmmov 0   ;;  %3267 = vmatprep.subr.bf16.mxu1 %v3362_v1  ;;  %3302 = vset.pattern.permute.xlu0 %v3376_v62  ;;  %vm2936_vm12 = vcmask 392192  }
 0x3fe   : > { %v2789_v50 = vsel %vm2125_vm7, %v2770_v45, %v2788_v47  ;;  %v2786_v56 = vrot.slane %v2733_v44, %v3929_v4  ;;  %3263 = vmatprep.mubr.msk.bf16.mxu1 %vm3375_vm6, %v3362_v1  ;;  %vm4208_vm7 = vcmask 64512  }
 0x3ff   : > { %v2791_v53 = vsel %vm2790_vm0, %v2774_v46, %v2789_v50  ;;  %vm4209_vm8 = vmmov %vm4208_vm7 }
 0x400   : > { %v2793_v57 = vsel %vm2792_vm5, %v2778_v48, %v2791_v53  ;;  %vm4210_vm13 = vmmov %vm4208_vm7 }
 0x401   : > { %v2795_v58 = vsel %vm2794_vm14, %v2782_v52, %v2793_v57 }
 0x402   : > { %v2797_v59 = vsel %vm2796_vm4, %v2786_v56, %v2795_v58 }
 0x403   : > { %2799 = vst.msk [vmem:[#allocation4 + $0x4] sm:$0xff] %vm4208_vm7, %v2797_v59 }
 0x40a   : > { %v2808_v61 = vld [vmem:[#allocation4 + $0x4] sm:$0xff] }
 0x40b   : > { %v2802_v49 = vld [vmem:[#allocation4 + $0x2] sm:$0xff]  ;;  %2810 = vrot.lane.b32.xlu1 %v2808_v61, %s3366_s13 }
 0x40c   : > { %v2800_v4 = vld [vmem:[#allocation4] sm:$0xff]  ;;  %2804 = vrot.lane.b32.xlu0 %v2802_v49, %s3364_s29 }
 0x40d   : > { %2801 = vst.msk [vmem:[#allocation6] sm:$0xff] %vm4209_vm8, %v2800_v4 }
 0x410   : > { %2885 = vperm.xlu0 %3302, %v3189_v63  }
 0x47d   : > { %v2811_v0 = vpop.permute.xlu1 %2810 }
 0x47e   : > { %v2805_v2 = vpop.permute.xlu0 %2804 }
 0x47f   : > { %2807 = vst.msk [vmem:[#allocation6] sm:$0xff] %vm2244_vm9, %v2805_v2 }
 0x480   : > { %2813 = vst.msk [vmem:[#allocation6] sm:$0xff] %vm2281_vm10, %v2811_v0  ;;  %vm2892_vm10 = vcmask 130048  }
 0x487   : > { %v2814_v3 = vld [vmem:[#allocation6] sm:$0xff] }
 0x488   : > { %v2815_v5 = vpack.c.bf16 %v2814_v3, %v2814_v3 }
 0x48a   : > { %3264 = vmatmul.mubr.msk.bf16.vlgmr.msra.gmra.mrb[4].mxu1 %vm2831_vm3, %v2815_v5 }
 0x48b   : > { %3273 = vmatprep.mubr.msk.bf16.mxu1 %vm3375_vm6, %v3362_v1  ;;  %3268 = vmatpush3.bf16.msra.mxu1 %v3349_v9 }
 0x48c   : > { %3269 = vmatprep.subr.bf16.mxu1 %v3362_v1 }
 0x48f   : > { %v2886_v6 = vpop.permute.xlu0 %2885  ;;  %3270 = vmatpush3.bf16.msra.mxu1 %v3350_v14 }
 0x490   : > { %3271 = vmatprep.subr.bf16.mxu1 %v3362_v1  ;;  %v3190_v1 = vld [vmem:[%s4201_s11] ss:$0 sm:$0xff] }
 0x493   : > { %3272 = vmatpush3.bf16.msra.mxu1 %v3351_v51 }
 0x55d   : > { %v2872_v41 = vpop.f32.mrb[4].mxu1 }
 0x55e   : > { %v2873_v7 = vadd.f32 %v3185_v40, %v2872_v41  ;;  %v3265_v8 = vpop.f32.mrb[5].mxu1 }
 0x55f   : > { %v2875_v10 = vpop.f32.mrb[6].mxu1 }
 0x560   : > { %vm2878_vm9 = vcmp.ge.f32.partialorder %v2873_v7, 0.0  ;;  %v2888_v11 = vmul.f32 %v2886_v6, %v2873_v7  ;;  %v3266_v12 = vpop.f32.mrb[7].mxu1 }
 0x562   : > { %v2889_v13 = vsel %vm2878_vm9, %v2873_v7, %v2888_v11 }
 0x563   : > { %2893 = vst.msk [vmem:[#allocation5 + $0x4] sm:$0xff] %vm2892_vm10, %v2889_v13 }
 0x56a   : > { %v2896_v15 = vld [vmem:[#allocation5 + $0x2] sm:$0xff] }
 0x56b   : > { %v2894_v16 = vld [vmem:[#allocation5] sm:$0xff]  ;;  %2898 = vrot.lane.b32.xlu1 %v2896_v15, %s3366_s13  ;;  %s3042_s13 = sshll.u32 %s4212_s24, 3 }
 0x56c   : > { %2895 = vst.msk [vmem:[#allocation6] sm:$0xff] %vm2892_vm10, %v2894_v16  ;;  %v2903_v17 = vld [vmem:[#allocation5 + $0x4] sm:$0xff]  ;;  %s413_s18 = scalar_lea.vmem %s4202_s12, %s3042_s13 }
 0x56f   : > { %2905 = vrot.lane.b32.xlu1 %v2903_v17, %s3370_s9 }
 0x5dd   : > { %v2899_v18 = vpop.permute.xlu1 %2898 }
 0x5de   : > { %2902 = vst.msk [vmem:[#allocation6] sm:$0xff] %vm2901_vm2, %v2899_v18 }
 0x5e1   : > { %v2906_v19 = vpop.permute.xlu1 %2905 }
 0x5e2   : > { %2909 = vst.msk [vmem:[#allocation6] sm:$0xff] %vm2908_vm11, %v2906_v19 }
 0x5e9   : > { %v2910_v20 = vld [vmem:[#allocation6] sm:$0xff] }
 0x5ea   : > { %v2911_v21 = vpack.c.bf16 %v2910_v20, %v2910_v20 }
 0x5ec   : > { %3274 = vmatmul.mubr.msk.bf16.vlgmr.msra.gmra.mrb[8].mxu1 %vm2936_vm12, %v2911_v21 }
 0x6bf   : > { %v2974_v22 = vpop.f32.mrb[8].mxu1 }
 0x6c0   : > { %v2975_v23 = vadd.f32 %v3190_v1, %v2974_v22  ;;  %v3275_v24 = vpop.f32.mrb[9].mxu1 }
 0x6c1   : > { %v2977_v25 = vpop.f32.mrb[10].mxu1 }
 0x6c2   : > { %3352 = vtanh.f32 %v2975_v23  ;;  %v3276_v26 = vpop.f32.mrb[11].mxu1 }
 0x6cc   : > { %v3353_v27 = vpop.eup %3352 }
 0x6cd   : > { %2981 = vst.msk [vmem:[%s413_s18] sm:$0xff] %vm4210_vm13, %v3353_v27 }
 0x6ce PF: > { %s24_s23 = sadd.s32 1, %s3360_s23  }
 0x6cf   : > { %p21_p4 = scmp.ge.s32.totalorder %s24_s23, 4  }
 0x6d1   :  { %23 = sbr.rel (!%p21_p4) target bundleno = 3 (0x3), region = 102 }

</bundles_post_ra>
